<compile_context>
chip_gen: v6e
topology: v6e:2x2x1
jax: 0.10.0
libtpu: 0.0.40
codegen_flags: <defaults>
</compile_context>

<pallas_src>
import functools
import math

import jax
import jax.numpy as jnp
from jax import lax
from jax.experimental import pallas as pl
from jax.experimental.pallas import tpu as pltpu


_NEG_INF = -1000000000.0


def _round_up(x, m):
    return ((x + m - 1) // m) * m


def _heads_per_group(num_heads, d_head):
    """Largest divisor of num_heads whose group lane width (g*d_head) <= 128.

    With d_head=64 this pairs heads so the context stores are 128-lane dense
    and 128-aligned; with d_head>=128 groups are single heads."""
    if d_head >= 128:
        return 1
    cap = max(1, 128 // d_head)
    best = 1
    for cand in range(1, min(cap, num_heads) + 1):
        if num_heads % cand == 0:
            best = cand
    return best


def _attention_heads(q_ref, k_ref, v_ref, ctx_ref, bias_row, *,
                     num_heads, d_head, q_rows,
                     q_col0=0, k_col0=0, v_col0=0, approx_recip=True):
    """Per-head scaled-dot-product attention.

    q/k/v refs hold projected activations (possibly one fused QKV scratch with
    column offsets).  Heads are processed in groups whose concatenated width is
    a multiple of 128 lanes when d_head allows it, so each ctx store is dense.
    """
    scale = 1.0 / math.sqrt(d_head)
    hpg = _heads_per_group(num_heads, d_head)
    gw = hpg * d_head
    # Static unroll: group count is small and static lane offsets keep the ref
    # slices zero-cost.  TODO(synk): lax.fori_loop with dynamic lane offsets
    # for very large head counts to further bound live ranges.
    for g in range(num_heads // hpg):
        parts = []
        for j in range(hpg):
            lo = (g * hpg + j) * d_head
            qh = q_ref[q_rows, q_col0 + lo:q_col0 + lo + d_head]      # (TQ, dh)
            kh = k_ref[:, k_col0 + lo:k_col0 + lo + d_head]           # (S,  dh)
            vh = v_ref[:, v_col0 + lo:v_col0 + lo + d_head]           # (S,  dh)

            # QK^T: contract last dims directly (no transposed copy of kh).
            scores = lax.dot_general(
                qh, kh, dimension_numbers=(((1,), (1,)), ((), ())),
                preferred_element_type=jnp.float32)                   # (TQ, S)
            # (1, S) bias row broadcasts in the add; no TQxS temporary.
            scores = scores * scale + bias_row

            # Numerically stable softmax; denominator via the EUP reciprocal.
            m = jnp.max(scores, axis=-1, keepdims=True)
            e = jnp.exp(scores - m)
            p = e * pl.reciprocal(jnp.sum(e, axis=-1, keepdims=True),
                                  approx=approx_recip)
            parts.append(jnp.dot(p.astype(vh.dtype), vh,
                                 preferred_element_type=jnp.float32))  # (TQ, dh)
        slab = parts[0] if hpg == 1 else jnp.concatenate(parts, axis=-1)
        ctx_ref[:, g * gw:(g + 1) * gw] = slab.astype(ctx_ref.dtype)


def _mha_cross_kernel(q_ref, k_ref, v_ref, mask_ref,
                      wq_ref, bq_ref, wk_ref, bk_ref, wv_ref, bv_ref,
                      wo_ref, bo_ref, out_ref,
                      q_scr, k_scr, v_scr, ctx_scr, *,
                      num_heads, d_head, approx_recip):
    """Cross-attention path (distinct query / key / value inputs).

    K/V are projected once per batch element (q-tile index 0) into persistent
    scratch and reused across all query tiles (q-tile grid axis "arbitrary").
    """
    @pl.when(pl.program_id(1) == 0)
    def _project_kv():
        k_scr[...] = (jnp.dot(k_ref[0].astype(wk_ref.dtype), wk_ref[...],
                              preferred_element_type=jnp.float32)
                      + bk_ref[...]).astype(k_scr.dtype)
        v_scr[...] = (jnp.dot(v_ref[0].astype(wv_ref.dtype), wv_ref[...],
                              preferred_element_type=jnp.float32)
                      + bv_ref[...]).astype(v_scr.dtype)

    # Q projection only for this tile's rows (weights pre-transposed to (in, out)).
    q_scr[...] = (jnp.dot(q_ref[0].astype(wq_ref.dtype), wq_ref[...],
                          preferred_element_type=jnp.float32)
                  + bq_ref[...]).astype(q_scr.dtype)

    keep = mask_ref[0]                                                 # (1, S)
    bias_row = jnp.where(keep == 0.0, _NEG_INF, 0.0).astype(jnp.float32)

    _attention_heads(q_scr, k_scr, v_scr, ctx_scr, bias_row,
                     num_heads=num_heads, d_head=d_head, q_rows=slice(None),
                     approx_recip=approx_recip)

    out = jnp.dot(ctx_scr[...], wo_ref[...],
                  preferred_element_type=jnp.float32) + bo_ref[...]
    out_ref[0] = out.astype(out_ref.dtype)


def _mha_self_kernel(x_ref, mask_ref, wqkv_ref, bqkv_ref, wo_ref, bo_ref, out_ref,
                     qkv_scr, ctx_scr, *, num_heads, d_head, tq, approx_recip):
    """Self-attention fast path: ONE fused (S,D)@(D,3D) projection per batch
    element, reused from persistent scratch across all query tiles."""
    d_model = num_heads * d_head

    @pl.when(pl.program_id(1) == 0)
    def _project_qkv():
        qkv_scr[...] = (jnp.dot(x_ref[0].astype(wqkv_ref.dtype), wqkv_ref[...],
                                preferred_element_type=jnp.float32)
                        + bqkv_ref[...]).astype(qkv_scr.dtype)

    keep = mask_ref[0]                                                 # (1, S)
    bias_row = jnp.where(keep == 0.0, _NEG_INF, 0.0).astype(jnp.float32)

    q_row0 = pl.multiple_of(pl.program_id(1) * tq, tq)
    _attention_heads(qkv_scr, qkv_scr, qkv_scr, ctx_scr, bias_row,
                     num_heads=num_heads, d_head=d_head,
                     q_rows=pl.ds(q_row0, tq),
                     q_col0=0, k_col0=d_model, v_col0=2 * d_model,
                     approx_recip=approx_recip)

    out = jnp.dot(ctx_scr[...], wo_ref[...],
                  preferred_element_type=jnp.float32) + bo_ref[...]
    out_ref[0] = out.astype(out_ref.dtype)


def _vmem_budget_bytes():
    """~85% of this chip's physical VMEM; conservative 64 MiB fallback."""
    try:
        cap = pltpu.get_tpu_info().vmem_capacity_bytes
    except Exception:
        cap = 64 << 20
    return int(cap * 0.85)


def _pick_q_tile(seq_len, cap):
    """Query-tile rows: >=128 for long sequences (pad + masked keys), otherwise
    the (sublane-rounded) sequence itself; never MXU-starving {8..64} tiles at
    large S."""
    if seq_len < 128:
        return _round_up(seq_len, 8)
    for t in (512, 256, 128):
        if t <= cap and seq_len % t == 0:
            return t
    return 128


def _cost_estimate(batch, seq, d_model, num_heads, itemsize):
    proj_flops = 8 * batch * seq * d_model * d_model        # q,k,v,out (once per batch)
    attn_flops = 4 * batch * seq * seq * d_model            # QK^T + PV over heads
    transcend = batch * num_heads * seq * (seq + 1)         # exp + reciprocal
    bytes_acc = (4 * batch * seq * d_model * itemsize
                 + batch * seq * 4
                 + 4 * (d_model * d_model + d_model) * 4)
    return pl.CostEstimate(flops=int(proj_flops + attn_flops),
                           transcendentals=int(transcend),
                           bytes_accessed=int(bytes_acc))


def multi_headed_attention(query, key, value, mask, params, *, num_heads,
                           matmul_dtype=jnp.bfloat16, precise_softmax=False):
    """query/key/value: (B, S, D); mask: (B, S) (nonzero = keep) or None.

    params: PyTorch-style Linear weights wq/wk/wv/wo of shape (D, D)
    (out_features, in_features) and biases bq/bk/bv/bo of shape (D,).
    matmul_dtype (default bf16) is the MXU operand dtype; accumulation is f32.
    precise_softmax=True uses an exact reciprocal in the softmax denominator.
    """
    B, S, D = query.shape
    assert D % num_heads == 0
    d_head = D // num_heads
    approx_recip = not precise_softmax

    # Self-attention fast path gated on object identity (perf only; equal-but-
    # distinct arrays take the general path and compute the same result).
    self_attention = (query is key) and (key is value)

    budget = _vmem_budget_bytes()
    tq_cap = 512 if budget >= (96 << 20) else 256            # 128-MiB vs 64-MiB parts
    tq = _pick_q_tile(S, tq_cap)
    S_pad = _round_up(S, tq)
    n_q = S_pad // tq
    pad = S_pad - S

    # Pad the sequence so tq stays >= 128 even when S % 128 != 0; padded key
    # rows are masked out below, padded query rows are sliced off at the end.
    def _pad_seq(x):
        return jnp.pad(x, ((0, 0), (0, pad), (0, 0))) if pad else x

    mask_f = jnp.ones((B, S), jnp.float32) if mask is None else mask.astype(jnp.float32)
    if pad:
        mask_f = jnp.pad(mask_f, ((0, 0), (0, pad)))          # pad keys -> masked
    mask3 = mask_f.reshape(B, 1, S_pad)

    if self_attention:
        query = _pad_seq(query)
        key = value = query
    else:
        query, key, value = _pad_seq(query), _pad_seq(key), _pad_seq(value)

    # Pre-transpose PyTorch (out, in) weights to (in, out) and pre-cast to the
    # MXU operand dtype once, outside the kernel.
    w_dtype = matmul_dtype if matmul_dtype is not None else params["wq"].dtype
    wq_t, wk_t, wv_t, wo_t = (params[k].T.astype(w_dtype)
                              for k in ("wq", "wk", "wv", "wo"))
    bq2, bk2, bv2, bo2 = (params[k].reshape(1, D).astype(jnp.float32)
                          for k in ("bq", "bk", "bv", "bo"))

    scr_dtype = matmul_dtype if matmul_dtype is not None else jnp.float32
    itemsize = jnp.dtype(query.dtype).itemsize
    wsize = jnp.dtype(w_dtype).itemsize
    ssize = jnp.dtype(scr_dtype).itemsize
    cost = _cost_estimate(B, S_pad, D, num_heads, itemsize)

    grid = (B, n_q)
    # K/V (or fused QKV) scratch is reused across q tiles -> the q-tile axis
    # MUST be "arbitrary"; batch stays "parallel" for megacore sharding.
    # TODO(synk): when B == 1 on multi-TC parts, hoist the K/V projection into
    # a separate pallas_call and keep the q-tile axis "parallel".
    dim_sem = ("parallel", "arbitrary")

    mask_spec = pl.BlockSpec((1, 1, S_pad), lambda b, i: (b, 0, 0))
    out_spec = pl.BlockSpec((1, tq, D), lambda b, i: (b, i, 0))
    w_spec = pl.BlockSpec((D, D), lambda b, i: (0, 0))
    b_spec = pl.BlockSpec((1, D), lambda b, i: (0, 0))
    seq_full = pl.BlockSpec((1, S_pad, D), lambda b, i: (b, 0, 0))

    if self_attention:
        wqkv_t = jnp.concatenate([wq_t, wk_t, wv_t], axis=1)           # (D, 3D)
        bqkv = jnp.concatenate([bq2, bk2, bv2], axis=1)                # (1, 3D)
        # TODO(synk): single-buffer the constant weight blocks (pipeline_mode).
        need = (2 * S_pad * D * itemsize + 2 * S_pad * 4
                + 2 * (3 * D * D * wsize + 3 * D * 4 + D * D * wsize + D * 4)
                + 2 * tq * D * itemsize
                + S_pad * 3 * D * ssize + tq * D * ssize)
        kernel = functools.partial(_mha_self_kernel, num_heads=num_heads,
                                   d_head=d_head, tq=tq, approx_recip=approx_recip)
        out = pl.pallas_call(
            kernel,
            out_shape=jax.ShapeDtypeStruct((B, S_pad, D), query.dtype),
            grid_spec=pltpu.PrefetchScalarGridSpec(
                num_scalar_prefetch=0,
                grid=grid,
                in_specs=[seq_full, mask_spec,
                          pl.BlockSpec((D, 3 * D), lambda b, i: (0, 0)),
                          pl.BlockSpec((1, 3 * D), lambda b, i: (0, 0)),
                          w_spec, b_spec],
                out_specs=out_spec,
                scratch_shapes=[pltpu.VMEM((S_pad, 3 * D), scr_dtype),
                                pltpu.VMEM((tq, D), scr_dtype)]),
            compiler_params=pltpu.CompilerParams(
                dimension_semantics=dim_sem,
                vmem_limit_bytes=int(min(budget, max(need + (8 << 20), 32 << 20)))),
            cost_estimate=cost,
        )(query, mask3, wqkv_t, bqkv, wo_t, bo2)
    else:
        q_tile_spec = pl.BlockSpec((1, tq, D), lambda b, i: (b, i, 0))
        need = (2 * tq * D * itemsize + 4 * S_pad * D * itemsize + 2 * S_pad * 4
                + 2 * (4 * D * D * wsize + 4 * D * 4)
                + 2 * tq * D * itemsize
                + (2 * tq * D + 2 * S_pad * D) * ssize)
        kernel = functools.partial(_mha_cross_kernel, num_heads=num_heads,
                                   d_head=d_head, approx_recip=approx_recip)
        out = pl.pallas_call(
            kernel,
            out_shape=jax.ShapeDtypeStruct((B, S_pad, D), query.dtype),
            grid_spec=pltpu.PrefetchScalarGridSpec(
                num_scalar_prefetch=0,
                grid=grid,
                in_specs=[q_tile_spec, seq_full, seq_full, mask_spec,
                          w_spec, b_spec, w_spec, b_spec, w_spec, b_spec,
                          w_spec, b_spec],
                out_specs=out_spec,
                scratch_shapes=[pltpu.VMEM((tq, D), scr_dtype),
                                pltpu.VMEM((S_pad, D), scr_dtype),
                                pltpu.VMEM((S_pad, D), scr_dtype),
                                pltpu.VMEM((tq, D), scr_dtype)]),
            compiler_params=pltpu.CompilerParams(
                dimension_semantics=dim_sem,
                vmem_limit_bytes=int(min(budget, max(need + (8 << 20), 32 << 20)))),
            cost_estimate=cost,
        )(query, key, value, mask3, wq_t, bq2, wk_t, bk2, wv_t, bv2, wo_t, bo2)

    return out[:, :S] if pad else out


def _reference(query, key, value, mask, params, *, num_heads):
    """Pure-JAX reference mirroring the PyTorch forward (eval mode)."""
    B, S, D = query.shape
    d_head = D // num_heads

    def lin(x, w, b):
        return x @ w.T + b

    q = lin(query, params["wq"], params["bq"]).reshape(B, S, num_heads, d_head).transpose(0, 2, 1, 3)
    k = lin(key, params["wk"], params["bk"]).reshape(B, S, num_heads, d_head).transpose(0, 2, 1, 3)
    v = lin(value, params["wv"], params["bv"]).reshape(B, S, num_heads, d_head).transpose(0, 2, 1, 3)

    scores = jnp.einsum("bhqd,bhkd->bhqk", q, k) / math.sqrt(d_head)
    m = mask[:, None, None, :]  # (B,1,1,S)
    scores = jnp.where(m == 0, _NEG_INF, scores)
    w = jax.nn.softmax(scores, axis=-1)
    ctx = jnp.einsum("bhqk,bhkd->bhqd", w, v).transpose(0, 2, 1, 3).reshape(B, S, D)
    return lin(ctx, params["wo"], params["bo"])


if __name__ == "__main__":
    B, S, D, H = 2, 8, 32, 4

    key0 = jax.random.PRNGKey(0)
    keys = jax.random.split(key0, 12)

    def linear_init(kw, kb, fan_in, shape_w, shape_b):
        bound = 1.0 / math.sqrt(fan_in)
        w = jax.random.uniform(kw, shape_w, jnp.float32, -bound, bound)
        b = jax.random.uniform(kb, shape_b, jnp.float32, -bound, bound)
        return w, b

    wq, bq = linear_init(keys[0], keys[1], D, (D, D), (D,))
    wk, bk = linear_init(keys[2], keys[3], D, (D, D), (D,))
    wv, bv = linear_init(keys[4], keys[5], D, (D, D), (D,))
    wo, bo = linear_init(keys[6], keys[7], D, (D, D), (D,))
    params = dict(wq=wq, bq=bq, wk=wk, bk=bk, wv=wv, bv=bv, wo=wo, bo=bo)

    query = jax.random.normal(keys[8], (B, S, D), jnp.float32)
    key_in = jax.random.normal(keys[9], (B, S, D), jnp.float32)
    value = jax.random.normal(keys[10], (B, S, D), jnp.float32)
    # mask: (B, S), 1 = attend, 0 = masked. Mask out the tail of batch 1.
    mask = jnp.ones((B, S), jnp.float32).at[1, 5:].set(0.0)

    ref_cross = _reference(query, key_in, value, mask, params, num_heads=H)
    ref_self = _reference(query, query, query, mask, params, num_heads=H)

    # 1) Default: bf16 MXU operands (recommended on v5e/v6e/v7x), approx recip.
    out = jax.block_until_ready(
        multi_headed_attention(query, key_in, value, mask, params, num_heads=H))
    assert out.shape == (B, S, D)
    assert jnp.allclose(out, ref_cross, atol=5e-2, rtol=5e-2), "cross (bf16) mismatch"

    out_self = jax.block_until_ready(
        multi_headed_attention(query, query, query, mask, params, num_heads=H))
    assert out_self.shape == (B, S, D)
    assert jnp.allclose(out_self, ref_self, atol=5e-2, rtol=5e-2), "self (bf16) mismatch"

    # 2) Precise path: f32 MXU operands + exact softmax reciprocal.
    out_f32 = jax.block_until_ready(
        multi_headed_attention(query, key_in, value, mask, params, num_heads=H,
                               matmul_dtype=None, precise_softmax=True))
    assert jnp.allclose(out_f32, ref_cross, atol=1e-3, rtol=1e-3), "cross (f32) mismatch"

    print("KERNEL_OK")
</pallas_src>

<mosaic_0001>
module attributes {stable_mosaic.version = 11 : i64} {
  func.func @_mha_cross_kernel(%arg0: i32, %arg1: i32, %arg2: memref<1x8x32xf32, #tpu.memory_space<vmem>>, %arg3: memref<1x8x32xf32, #tpu.memory_space<vmem>>, %arg4: memref<1x8x32xf32, #tpu.memory_space<vmem>>, %arg5: memref<1x1x8xf32, #tpu.memory_space<vmem>>, %arg6: memref<32x32xbf16, #tpu.memory_space<vmem>>, %arg7: memref<1x32xf32, #tpu.memory_space<vmem>>, %arg8: memref<32x32xbf16, #tpu.memory_space<vmem>>, %arg9: memref<1x32xf32, #tpu.memory_space<vmem>>, %arg10: memref<32x32xbf16, #tpu.memory_space<vmem>>, %arg11: memref<1x32xf32, #tpu.memory_space<vmem>>, %arg12: memref<32x32xbf16, #tpu.memory_space<vmem>>, %arg13: memref<1x32xf32, #tpu.memory_space<vmem>>, %arg14: memref<1x8x32xf32, #tpu.memory_space<vmem>>, %arg15: memref<8x32xbf16, #tpu.memory_space<vmem>>, %arg16: memref<8x32xbf16, #tpu.memory_space<vmem>>, %arg17: memref<8x32xbf16, #tpu.memory_space<vmem>>, %arg18: memref<8x32xbf16, #tpu.memory_space<vmem>>) attributes {dimension_semantics = [#tpu.dimension_semantics<parallel>, #tpu.dimension_semantics<arbitrary>], iteration_bounds = array<i64: 2, 1>, scalar_prefetch = 0 : i64, scratch_operands = 4 : i64, tpu.core_type = #tpu.core_type<tc>, window_params = [{transform_indices = @transform_0, window_bounds = array<i64: 1, 8, 32>}, {transform_indices = @transform_1, window_bounds = array<i64: 1, 8, 32>}, {transform_indices = @transform_2, window_bounds = array<i64: 1, 8, 32>}, {transform_indices = @transform_3, window_bounds = array<i64: 1, 1, 8>}, {pipeline_mode = #tpu.pipeline_mode<synchronous>, transform_indices = @transform_4, window_bounds = array<i64: 32, 32>}, {pipeline_mode = #tpu.pipeline_mode<synchronous>, transform_indices = @transform_5, window_bounds = array<i64: 1, 32>}, {pipeline_mode = #tpu.pipeline_mode<synchronous>, transform_indices = @transform_6, window_bounds = array<i64: 32, 32>}, {pipeline_mode = #tpu.pipeline_mode<synchronous>, transform_indices = @transform_7, window_bounds = array<i64: 1, 32>}, {pipeline_mode = #tpu.pipeline_mode<synchronous>, transform_indices = @transform_8, window_bounds = array<i64: 32, 32>}, {pipeline_mode = #tpu.pipeline_mode<synchronous>, transform_indices = @transform_9, window_bounds = array<i64: 1, 32>}, {pipeline_mode = #tpu.pipeline_mode<synchronous>, transform_indices = @transform_10, window_bounds = array<i64: 32, 32>}, {pipeline_mode = #tpu.pipeline_mode<synchronous>, transform_indices = @transform_11, window_bounds = array<i64: 1, 32>}, {transform_indices = @transform_12, window_bounds = array<i64: 1, 8, 32>}]} {
    %c0_i32 = arith.constant 0 : i32
    %0 = arith.cmpi eq, %arg1, %c0_i32 : i32
    %1 = arith.extui %0 : i1 to i32
    %c0_i32_0 = arith.constant 0 : i32
    %2 = arith.cmpi ne, %1, %c0_i32_0 : i32
    scf.if %2 {
      %c0_68 = arith.constant 0 : index
      %c0_69 = arith.constant 0 : index
      %c0_70 = arith.constant 0 : index
      %112 = vector.load %arg3[%c0_68, %c0_69, %c0_70] : memref<1x8x32xf32, #tpu.memory_space<vmem>>, vector<1x8x32xf32>
      %113 = vector.shape_cast %112 : vector<1x8x32xf32> to vector<8x32xf32>
      %114 = arith.truncf %113 : vector<8x32xf32> to vector<8x32xbf16>
      %c0_71 = arith.constant 0 : index
      %c0_72 = arith.constant 0 : index
      %115 = vector.load %arg8[%c0_71, %c0_72] : memref<32x32xbf16, #tpu.memory_space<vmem>>, vector<32x32xbf16>
      %cst_73 = arith.constant dense<0.000000e+00> : vector<8x32xf32>
      %116 = tpu.matmul %114, %115, %cst_73 {dimension_numbers = #tpu.dot_dimension_numbers<[1], [0], [0], [1], [0, 0, 1, 1], [], []>} : vector<8x32xbf16>, vector<32x32xbf16>, vector<8x32xf32> -> vector<8x32xf32>
      %c0_74 = arith.constant 0 : index
      %c0_75 = arith.constant 0 : index
      %117 = vector.load %arg9[%c0_74, %c0_75] : memref<1x32xf32, #tpu.memory_space<vmem>>, vector<1x32xf32>
      %118 = vector.broadcast %117 : vector<1x32xf32> to vector<8x32xf32>
      %119 = arith.addf %116, %118 : vector<8x32xf32>
      %120 = arith.truncf %119 : vector<8x32xf32> to vector<8x32xbf16>
      %c0_76 = arith.constant 0 : index
      %c0_77 = arith.constant 0 : index
      %121 = vector.load %arg16[%c0_76, %c0_77] : memref<8x32xbf16, #tpu.memory_space<vmem>>, vector<8x32xbf16>
      tpu.vector_store %arg16[%c0_76, %c0_77], %120 {strides = array<i32>} : memref<8x32xbf16, #tpu.memory_space<vmem>>, vector<8x32xbf16>,
      %c0_78 = arith.constant 0 : index
      %c0_79 = arith.constant 0 : index
      %c0_80 = arith.constant 0 : index
      %122 = vector.load %arg4[%c0_78, %c0_79, %c0_80] : memref<1x8x32xf32, #tpu.memory_space<vmem>>, vector<1x8x32xf32>
      %123 = vector.shape_cast %122 : vector<1x8x32xf32> to vector<8x32xf32>
      %124 = arith.truncf %123 : vector<8x32xf32> to vector<8x32xbf16>
      %c0_81 = arith.constant 0 : index
      %c0_82 = arith.constant 0 : index
      %125 = vector.load %arg10[%c0_81, %c0_82] : memref<32x32xbf16, #tpu.memory_space<vmem>>, vector<32x32xbf16>
      %cst_83 = arith.constant dense<0.000000e+00> : vector<8x32xf32>
      %126 = tpu.matmul %124, %125, %cst_83 {dimension_numbers = #tpu.dot_dimension_numbers<[1], [0], [0], [1], [0, 0, 1, 1], [], []>} : vector<8x32xbf16>, vector<32x32xbf16>, vector<8x32xf32> -> vector<8x32xf32>
      %c0_84 = arith.constant 0 : index
      %c0_85 = arith.constant 0 : index
      %127 = vector.load %arg11[%c0_84, %c0_85] : memref<1x32xf32, #tpu.memory_space<vmem>>, vector<1x32xf32>
      %128 = vector.broadcast %127 : vector<1x32xf32> to vector<8x32xf32>
      %129 = arith.addf %126, %128 : vector<8x32xf32>
      %130 = arith.truncf %129 : vector<8x32xf32> to vector<8x32xbf16>
      %c0_86 = arith.constant 0 : index
      %c0_87 = arith.constant 0 : index
      %131 = vector.load %arg17[%c0_86, %c0_87] : memref<8x32xbf16, #tpu.memory_space<vmem>>, vector<8x32xbf16>
      tpu.vector_store %arg17[%c0_86, %c0_87], %130 {strides = array<i32>} : memref<8x32xbf16, #tpu.memory_space<vmem>>, vector<8x32xbf16>,
    } else {
    }
    %c0 = arith.constant 0 : index
    %c0_1 = arith.constant 0 : index
    %c0_2 = arith.constant 0 : index
    %3 = vector.load %arg2[%c0, %c0_1, %c0_2] : memref<1x8x32xf32, #tpu.memory_space<vmem>>, vector<1x8x32xf32>
    %4 = vector.shape_cast %3 : vector<1x8x32xf32> to vector<8x32xf32>
    %5 = arith.truncf %4 : vector<8x32xf32> to vector<8x32xbf16>
    %c0_3 = arith.constant 0 : index
    %c0_4 = arith.constant 0 : index
    %6 = vector.load %arg6[%c0_3, %c0_4] : memref<32x32xbf16, #tpu.memory_space<vmem>>, vector<32x32xbf16>
    %cst = arith.constant dense<0.000000e+00> : vector<8x32xf32>
    %7 = tpu.matmul %5, %6, %cst {dimension_numbers = #tpu.dot_dimension_numbers<[1], [0], [0], [1], [0, 0, 1, 1], [], []>} : vector<8x32xbf16>, vector<32x32xbf16>, vector<8x32xf32> -> vector<8x32xf32>
    %c0_5 = arith.constant 0 : index
    %c0_6 = arith.constant 0 : index
    %8 = vector.load %arg7[%c0_5, %c0_6] : memref<1x32xf32, #tpu.memory_space<vmem>>, vector<1x32xf32>
    %9 = vector.broadcast %8 : vector<1x32xf32> to vector<8x32xf32>
    %10 = arith.addf %7, %9 : vector<8x32xf32>
    %11 = arith.truncf %10 : vector<8x32xf32> to vector<8x32xbf16>
    %c0_7 = arith.constant 0 : index
    %c0_8 = arith.constant 0 : index
    %12 = vector.load %arg15[%c0_7, %c0_8] : memref<8x32xbf16, #tpu.memory_space<vmem>>, vector<8x32xbf16>
    tpu.vector_store %arg15[%c0_7, %c0_8], %11 {strides = array<i32>} : memref<8x32xbf16, #tpu.memory_space<vmem>>, vector<8x32xbf16>,
    %c0_9 = arith.constant 0 : index
    %c0_10 = arith.constant 0 : index
    %c0_11 = arith.constant 0 : index
    %13 = vector.load %arg5[%c0_9, %c0_10, %c0_11] : memref<1x1x8xf32, #tpu.memory_space<vmem>>, vector<1x1x8xf32>
    %14 = vector.shape_cast %13 : vector<1x1x8xf32> to vector<1x8xf32>
    %cst_12 = arith.constant 0.000000e+00 : f32
    %15 = vector.broadcast %cst_12 : f32 to vector<1x8xf32>
    %16 = arith.cmpf oeq, %14, %15 : vector<1x8xf32>
    %cst_13 = arith.constant -1.000000e+09 : f32
    %cst_14 = arith.constant 0.000000e+00 : f32
    %17 = vector.broadcast %cst_13 : f32 to vector<1x8xf32>
    %18 = vector.broadcast %cst_14 : f32 to vector<1x8xf32>
    %19 = arith.select %16, %17, %18 : vector<1x8xi1>, vector<1x8xf32>
    %c0_15 = arith.constant 0 : index
    %c0_16 = arith.constant 0 : index
    %20 = vector.load %arg15[%c0_15, %c0_16] : memref<8x32xbf16, #tpu.memory_space<vmem>>, vector<8x8xbf16>
    %c0_17 = arith.constant 0 : index
    %c0_18 = arith.constant 0 : index
    %21 = vector.load %arg16[%c0_17, %c0_18] : memref<8x32xbf16, #tpu.memory_space<vmem>>, vector<8x8xbf16>
    %c0_19 = arith.constant 0 : index
    %c0_20 = arith.constant 0 : index
    %22 = vector.load %arg17[%c0_19, %c0_20] : memref<8x32xbf16, #tpu.memory_space<vmem>>, vector<8x8xbf16>
    %cst_21 = arith.constant dense<0.000000e+00> : vector<8x8xf32>
    %23 = tpu.matmul %20, %21, %cst_21 {dimension_numbers = #tpu.dot_dimension_numbers<[1], [1], [0], [0], [0, 0, 1, 0], [], []>} : vector<8x8xbf16>, vector<8x8xbf16>, vector<8x8xf32> -> vector<8x8xf32>
    %cst_22 = arith.constant 0.353553385 : f32
    %24 = vector.broadcast %cst_22 : f32 to vector<8x8xf32>
    %25 = arith.mulf %23, %24 : vector<8x8xf32>
    %26 = vector.broadcast %19 : vector<1x8xf32> to vector<8x8xf32>
    %27 = arith.addf %25, %26 : vector<8x8xf32>
    %cst_23 = arith.constant dense<0xFF800000> : vector<8xf32>
    %28 = vector.multi_reduction <maximumf>, %27, %cst_23 [1] : vector<8x8xf32> to vector<8xf32>
    %29 = vector.shape_cast %28 : vector<8xf32> to vector<8x1xf32>
    %30 = vector.broadcast %29 : vector<8x1xf32> to vector<8x8xf32>
    %31 = arith.subf %27, %30 : vector<8x8xf32>
    %32 = math.exp %31 : vector<8x8xf32>
    %cst_24 = arith.constant dense<0.000000e+00> : vector<8xf32>
    %33 = vector.multi_reduction <add>, %32, %cst_24 [1] : vector<8x8xf32> to vector<8xf32>
    %34 = vector.shape_cast %33 : vector<8xf32> to vector<8x1xf32>
    %35 = tpu.reciprocal %34 {approx = true} : vector<8x1xf32> -> vector<8x1xf32>
    %36 = vector.broadcast %35 : vector<8x1xf32> to vector<8x8xf32>
    %37 = arith.mulf %32, %36 : vector<8x8xf32>
    %38 = arith.truncf %37 : vector<8x8xf32> to vector<8x8xbf16>
    %cst_25 = arith.constant dense<0.000000e+00> : vector<8x8xf32>
    %39 = tpu.matmul %38, %22, %cst_25 {dimension_numbers = #tpu.dot_dimension_numbers<[1], [0], [0], [1], [0, 0, 1, 1], [], []>} : vector<8x8xbf16>, vector<8x8xbf16>, vector<8x8xf32> -> vector<8x8xf32>
    %c0_26 = arith.constant 0 : index
    %c8 = arith.constant 8 : index
    %40 = vector.load %arg15[%c0_26, %c8] : memref<8x32xbf16, #tpu.memory_space<vmem>>, vector<8x8xbf16>
    %c0_27 = arith.constant 0 : index
    %c8_28 = arith.constant 8 : index
    %41 = vector.load %arg16[%c0_27, %c8_28] : memref<8x32xbf16, #tpu.memory_space<vmem>>, vector<8x8xbf16>
    %c0_29 = arith.constant 0 : index
    %c8_30 = arith.constant 8 : index
    %42 = vector.load %arg17[%c0_29, %c8_30] : memref<8x32xbf16, #tpu.memory_space<vmem>>, vector<8x8xbf16>
    %cst_31 = arith.constant dense<0.000000e+00> : vector<8x8xf32>
    %43 = tpu.matmul %40, %41, %cst_31 {dimension_numbers = #tpu.dot_dimension_numbers<[1], [1], [0], [0], [0, 0, 1, 0], [], []>} : vector<8x8xbf16>, vector<8x8xbf16>, vector<8x8xf32> -> vector<8x8xf32>
    %cst_32 = arith.constant 0.353553385 : f32
    %44 = vector.broadcast %cst_32 : f32 to vector<8x8xf32>
    %45 = arith.mulf %43, %44 : vector<8x8xf32>
    %46 = vector.broadcast %19 : vector<1x8xf32> to vector<8x8xf32>
    %47 = arith.addf %45, %46 : vector<8x8xf32>
    %cst_33 = arith.constant dense<0xFF800000> : vector<8xf32>
    %48 = vector.multi_reduction <maximumf>, %47, %cst_33 [1] : vector<8x8xf32> to vector<8xf32>
    %49 = vector.shape_cast %48 : vector<8xf32> to vector<8x1xf32>
    %50 = vector.broadcast %49 : vector<8x1xf32> to vector<8x8xf32>
    %51 = arith.subf %47, %50 : vector<8x8xf32>
    %52 = math.exp %51 : vector<8x8xf32>
    %cst_34 = arith.constant dense<0.000000e+00> : vector<8xf32>
    %53 = vector.multi_reduction <add>, %52, %cst_34 [1] : vector<8x8xf32> to vector<8xf32>
    %54 = vector.shape_cast %53 : vector<8xf32> to vector<8x1xf32>
    %55 = tpu.reciprocal %54 {approx = true} : vector<8x1xf32> -> vector<8x1xf32>
    %56 = vector.broadcast %55 : vector<8x1xf32> to vector<8x8xf32>
    %57 = arith.mulf %52, %56 : vector<8x8xf32>
    %58 = arith.truncf %57 : vector<8x8xf32> to vector<8x8xbf16>
    %cst_35 = arith.constant dense<0.000000e+00> : vector<8x8xf32>
    %59 = tpu.matmul %58, %42, %cst_35 {dimension_numbers = #tpu.dot_dimension_numbers<[1], [0], [0], [1], [0, 0, 1, 1], [], []>} : vector<8x8xbf16>, vector<8x8xbf16>, vector<8x8xf32> -> vector<8x8xf32>
    %c0_36 = arith.constant 0 : index
    %c16 = arith.constant 16 : index
    %60 = vector.load %arg15[%c0_36, %c16] : memref<8x32xbf16, #tpu.memory_space<vmem>>, vector<8x8xbf16>
    %c0_37 = arith.constant 0 : index
    %c16_38 = arith.constant 16 : index
    %61 = vector.load %arg16[%c0_37, %c16_38] : memref<8x32xbf16, #tpu.memory_space<vmem>>, vector<8x8xbf16>
    %c0_39 = arith.constant 0 : index
    %c16_40 = arith.constant 16 : index
    %62 = vector.load %arg17[%c0_39, %c16_40] : memref<8x32xbf16, #tpu.memory_space<vmem>>, vector<8x8xbf16>
    %cst_41 = arith.constant dense<0.000000e+00> : vector<8x8xf32>
    %63 = tpu.matmul %60, %61, %cst_41 {dimension_numbers = #tpu.dot_dimension_numbers<[1], [1], [0], [0], [0, 0, 1, 0], [], []>} : vector<8x8xbf16>, vector<8x8xbf16>, vector<8x8xf32> -> vector<8x8xf32>
    %cst_42 = arith.constant 0.353553385 : f32
    %64 = vector.broadcast %cst_42 : f32 to vector<8x8xf32>
    %65 = arith.mulf %63, %64 : vector<8x8xf32>
    %66 = vector.broadcast %19 : vector<1x8xf32> to vector<8x8xf32>
    %67 = arith.addf %65, %66 : vector<8x8xf32>
    %cst_43 = arith.constant dense<0xFF800000> : vector<8xf32>
    %68 = vector.multi_reduction <maximumf>, %67, %cst_43 [1] : vector<8x8xf32> to vector<8xf32>
    %69 = vector.shape_cast %68 : vector<8xf32> to vector<8x1xf32>
    %70 = vector.broadcast %69 : vector<8x1xf32> to vector<8x8xf32>
    %71 = arith.subf %67, %70 : vector<8x8xf32>
    %72 = math.exp %71 : vector<8x8xf32>
    %cst_44 = arith.constant dense<0.000000e+00> : vector<8xf32>
    %73 = vector.multi_reduction <add>, %72, %cst_44 [1] : vector<8x8xf32> to vector<8xf32>
    %74 = vector.shape_cast %73 : vector<8xf32> to vector<8x1xf32>
    %75 = tpu.reciprocal %74 {approx = true} : vector<8x1xf32> -> vector<8x1xf32>
    %76 = vector.broadcast %75 : vector<8x1xf32> to vector<8x8xf32>
    %77 = arith.mulf %72, %76 : vector<8x8xf32>
    %78 = arith.truncf %77 : vector<8x8xf32> to vector<8x8xbf16>
    %cst_45 = arith.constant dense<0.000000e+00> : vector<8x8xf32>
    %79 = tpu.matmul %78, %62, %cst_45 {dimension_numbers = #tpu.dot_dimension_numbers<[1], [0], [0], [1], [0, 0, 1, 1], [], []>} : vector<8x8xbf16>, vector<8x8xbf16>, vector<8x8xf32> -> vector<8x8xf32>
    %c0_46 = arith.constant 0 : index
    %c24 = arith.constant 24 : index
    %80 = vector.load %arg15[%c0_46, %c24] : memref<8x32xbf16, #tpu.memory_space<vmem>>, vector<8x8xbf16>
    %c0_47 = arith.constant 0 : index
    %c24_48 = arith.constant 24 : index
    %81 = vector.load %arg16[%c0_47, %c24_48] : memref<8x32xbf16, #tpu.memory_space<vmem>>, vector<8x8xbf16>
    %c0_49 = arith.constant 0 : index
    %c24_50 = arith.constant 24 : index
    %82 = vector.load %arg17[%c0_49, %c24_50] : memref<8x32xbf16, #tpu.memory_space<vmem>>, vector<8x8xbf16>
    %cst_51 = arith.constant dense<0.000000e+00> : vector<8x8xf32>
    %83 = tpu.matmul %80, %81, %cst_51 {dimension_numbers = #tpu.dot_dimension_numbers<[1], [1], [0], [0], [0, 0, 1, 0], [], []>} : vector<8x8xbf16>, vector<8x8xbf16>, vector<8x8xf32> -> vector<8x8xf32>
    %cst_52 = arith.constant 0.353553385 : f32
    %84 = vector.broadcast %cst_52 : f32 to vector<8x8xf32>
    %85 = arith.mulf %83, %84 : vector<8x8xf32>
    %86 = vector.broadcast %19 : vector<1x8xf32> to vector<8x8xf32>
    %87 = arith.addf %85, %86 : vector<8x8xf32>
    %cst_53 = arith.constant dense<0xFF800000> : vector<8xf32>
    %88 = vector.multi_reduction <maximumf>, %87, %cst_53 [1] : vector<8x8xf32> to vector<8xf32>
    %89 = vector.shape_cast %88 : vector<8xf32> to vector<8x1xf32>
    %90 = vector.broadcast %89 : vector<8x1xf32> to vector<8x8xf32>
    %91 = arith.subf %87, %90 : vector<8x8xf32>
    %92 = math.exp %91 : vector<8x8xf32>
    %cst_54 = arith.constant dense<0.000000e+00> : vector<8xf32>
    %93 = vector.multi_reduction <add>, %92, %cst_54 [1] : vector<8x8xf32> to vector<8xf32>
    %94 = vector.shape_cast %93 : vector<8xf32> to vector<8x1xf32>
    %95 = tpu.reciprocal %94 {approx = true} : vector<8x1xf32> -> vector<8x1xf32>
    %96 = vector.broadcast %95 : vector<8x1xf32> to vector<8x8xf32>
    %97 = arith.mulf %92, %96 : vector<8x8xf32>
    %98 = arith.truncf %97 : vector<8x8xf32> to vector<8x8xbf16>
    %cst_55 = arith.constant dense<0.000000e+00> : vector<8x8xf32>
    %99 = tpu.matmul %98, %82, %cst_55 {dimension_numbers = #tpu.dot_dimension_numbers<[1], [0], [0], [1], [0, 0, 1, 1], [], []>} : vector<8x8xbf16>, vector<8x8xbf16>, vector<8x8xf32> -> vector<8x8xf32>
    %100 = tpu.concatenate %39, %59, %79, %99 in 1 : vector<8x8xf32>, vector<8x8xf32>, vector<8x8xf32>, vector<8x8xf32> -> vector<8x32xf32>
    %101 = arith.truncf %100 : vector<8x32xf32> to vector<8x32xbf16>
    %c0_56 = arith.constant 0 : index
    %c0_57 = arith.constant 0 : index
    %102 = vector.load %arg18[%c0_56, %c0_57] : memref<8x32xbf16, #tpu.memory_space<vmem>>, vector<8x32xbf16>
    tpu.vector_store %arg18[%c0_56, %c0_57], %101 {strides = array<i32>} : memref<8x32xbf16, #tpu.memory_space<vmem>>, vector<8x32xbf16>,
    %c0_58 = arith.constant 0 : index
    %c0_59 = arith.constant 0 : index
    %103 = vector.load %arg18[%c0_58, %c0_59] : memref<8x32xbf16, #tpu.memory_space<vmem>>, vector<8x32xbf16>
    %c0_60 = arith.constant 0 : index
    %c0_61 = arith.constant 0 : index
    %104 = vector.load %arg12[%c0_60, %c0_61] : memref<32x32xbf16, #tpu.memory_space<vmem>>, vector<32x32xbf16>
    %cst_62 = arith.constant dense<0.000000e+00> : vector<8x32xf32>
    %105 = tpu.matmul %103, %104, %cst_62 {dimension_numbers = #tpu.dot_dimension_numbers<[1], [0], [0], [1], [0, 0, 1, 1], [], []>} : vector<8x32xbf16>, vector<32x32xbf16>, vector<8x32xf32> -> vector<8x32xf32>
    %c0_63 = arith.constant 0 : index
    %c0_64 = arith.constant 0 : index
    %106 = vector.load %arg13[%c0_63, %c0_64] : memref<1x32xf32, #tpu.memory_space<vmem>>, vector<1x32xf32>
    %107 = vector.broadcast %106 : vector<1x32xf32> to vector<8x32xf32>
    %108 = arith.addf %105, %107 : vector<8x32xf32>
    %c0_65 = arith.constant 0 : index
    %c0_66 = arith.constant 0 : index
    %c0_67 = arith.constant 0 : index
    %109 = vector.load %arg14[%c0_65, %c0_66, %c0_67] : memref<1x8x32xf32, #tpu.memory_space<vmem>>, vector<1x8x32xf32>
    %110 = vector.shape_cast %109 : vector<1x8x32xf32> to vector<8x32xf32>
    %111 = vector.shape_cast %108 : vector<8x32xf32> to vector<1x8x32xf32>
    tpu.vector_store %arg14[%c0_65, %c0_66, %c0_67], %111 {strides = array<i32>} : memref<1x8x32xf32, #tpu.memory_space<vmem>>, vector<1x8x32xf32>,
    return
  }
  func.func @transform_0(%arg0: i32, %arg1: i32) -> (i32, i32, i32) {
    %c0_i32 = arith.constant 0 : i32
    %c0_i32_0 = arith.constant 0 : i32
    return %arg0, %arg1, %c0_i32 : i32, i32, i32
  }
  func.func @transform_1(%arg0: i32, %arg1: i32) -> (i32, i32, i32) {
    %c0_i32 = arith.constant 0 : i32
    %c0_i32_0 = arith.constant 0 : i32
    %c0_i32_1 = arith.constant 0 : i32
    return %arg0, %c0_i32, %c0_i32_0 : i32, i32, i32
  }
  func.func @transform_2(%arg0: i32, %arg1: i32) -> (i32, i32, i32) {
    %c0_i32 = arith.constant 0 : i32
    %c0_i32_0 = arith.constant 0 : i32
    %c0_i32_1 = arith.constant 0 : i32
    return %arg0, %c0_i32, %c0_i32_0 : i32, i32, i32
  }
  func.func @transform_3(%arg0: i32, %arg1: i32) -> (i32, i32, i32) {
    %c0_i32 = arith.constant 0 : i32
    %c0_i32_0 = arith.constant 0 : i32
    %c0_i32_1 = arith.constant 0 : i32
    return %arg0, %c0_i32, %c0_i32_0 : i32, i32, i32
  }
  func.func @transform_4(%arg0: i32, %arg1: i32) -> (i32, i32) {
    %c0_i32 = arith.constant 0 : i32
    %c0_i32_0 = arith.constant 0 : i32
    %c0_i32_1 = arith.constant 0 : i32
    return %c0_i32, %c0_i32_0 : i32, i32
  }
  func.func @transform_5(%arg0: i32, %arg1: i32) -> (i32, i32) {
    %c0_i32 = arith.constant 0 : i32
    %c0_i32_0 = arith.constant 0 : i32
    %c0_i32_1 = arith.constant 0 : i32
    return %c0_i32, %c0_i32_0 : i32, i32
  }
  func.func @transform_6(%arg0: i32, %arg1: i32) -> (i32, i32) {
    %c0_i32 = arith.constant 0 : i32
    %c0_i32_0 = arith.constant 0 : i32
    %c0_i32_1 = arith.constant 0 : i32
    return %c0_i32, %c0_i32_0 : i32, i32
  }
  func.func @transform_7(%arg0: i32, %arg1: i32) -> (i32, i32) {
    %c0_i32 = arith.constant 0 : i32
    %c0_i32_0 = arith.constant 0 : i32
    %c0_i32_1 = arith.constant 0 : i32
    return %c0_i32, %c0_i32_0 : i32, i32
  }
  func.func @transform_8(%arg0: i32, %arg1: i32) -> (i32, i32) {
    %c0_i32 = arith.constant 0 : i32
    %c0_i32_0 = arith.constant 0 : i32
    %c0_i32_1 = arith.constant 0 : i32
    return %c0_i32, %c0_i32_0 : i32, i32
  }
  func.func @transform_9(%arg0: i32, %arg1: i32) -> (i32, i32) {
    %c0_i32 = arith.constant 0 : i32
    %c0_i32_0 = arith.constant 0 : i32
    %c0_i32_1 = arith.constant 0 : i32
    return %c0_i32, %c0_i32_0 : i32, i32
  }
  func.func @transform_10(%arg0: i32, %arg1: i32) -> (i32, i32) {
    %c0_i32 = arith.constant 0 : i32
    %c0_i32_0 = arith.constant 0 : i32
    %c0_i32_1 = arith.constant 0 : i32
    return %c0_i32, %c0_i32_0 : i32, i32
  }
  func.func @transform_11(%arg0: i32, %arg1: i32) -> (i32, i32) {
    %c0_i32 = arith.constant 0 : i32
    %c0_i32_0 = arith.constant 0 : i32
    %c0_i32_1 = arith.constant 0 : i32
    return %c0_i32, %c0_i32_0 : i32, i32
  }
  func.func @transform_12(%arg0: i32, %arg1: i32) -> (i32, i32, i32) {
    %c0_i32 = arith.constant 0 : i32
    %c0_i32_0 = arith.constant 0 : i32
    return %arg0, %arg1, %c0_i32 : i32, i32, i32
  }
}

</mosaic_0001>

<bundles_post_ra>
// kernel: tpu_custom_call.1
= control target key start
LH: loop header
LB: loop body
LE: loop exit
PB: predicated region body
PF: predicated region fallthrough
CT: control target
= control target key end

     0   :  { %s2729_s0 = inlined_call_operand.hbm [shape: f32[2,8,32], index: 0, kind: input, shape index: {}]   ;;  %s2730_s1 = inlined_call_operand.hbm [shape: f32[2,8,32], index: 1, kind: input, shape index: {}]   ;;  %s2731_s2 = inlined_call_operand.hbm [shape: f32[2,8,32], index: 2, kind: input, shape index: {}]   ;;  %s2732_s3 = inlined_call_operand.vmem [shape: f32[2,1,8], index: 3, kind: input, shape index: {}]   ;;  %s2733_s4 = inlined_call_operand.hbm [shape: bf16[32,32], index: 4, kind: input, shape index: {}]   ;;  %s2734_s5 = inlined_call_operand.hbm [shape: f32[1,32], index: 5, kind: input, shape index: {}]   ;;  %s2735_s6 = inlined_call_operand.hbm [shape: bf16[32,32], index: 6, kind: input, shape index: {}]   ;;  %s2736_s7 = inlined_call_operand.hbm [shape: f32[1,32], index: 7, kind: input, shape index: {}]   ;;  %s2737_s8 = inlined_call_operand.hbm [shape: bf16[32,32], index: 8, kind: input, shape index: {}]   ;;  %s2738_s9 = inlined_call_operand.hbm [shape: f32[1,32], index: 9, kind: input, shape index: {}]   ;;  %s2739_s10 = inlined_call_operand.vmem [shape: bf16[32,32], index: 10, kind: input, shape index: {}]   ;;  %s2740_s11 = inlined_call_operand.vmem [shape: f32[1,32], index: 11, kind: input, shape index: {}]   ;;  %s2741_s12 = inlined_call_operand.hbm [shape: f32[2,8,32], index: 12, kind: output, shape index: {}]  }
   0x1   :  { %2759 = sst [smem:[#allocation35_spill]] %s2733_s4 }
   0x2   :  { %2760 = sst [smem:[#allocation36_spill]] %s2735_s6 }
   0x3   :  { %2761 = sst [smem:[#allocation37_spill]] %s2737_s8 }
   0x4   :  { %2762 = sst [smem:[#allocation38_spill]] %s2740_s11 }
   0x5   :  { %2763 = sst [smem:[#allocation39_spill]] %s2741_s12 }
   0x6   :  { %17 = vsyncpa [#allocation7], 0 }
   0x7   :  { %19 = vsyncpa [#allocation7 + $0x1], 0 }
   0x8   :  { %20 = vsyncpa [#allocation10], 0 }
   0x9   :  { %22 = vsyncpa [#allocation10 + $0x1], 0 }
   0xa   :  { %23 = vsyncpa [#allocation13], 0 }
   0xb   :  { %24 = vsyncpa [#allocation16], 0 }
   0xc   :  { %25 = vsyncpa [#allocation19], 0 }
   0xd   :  { %26 = vsyncpa [#allocation8], 0 }
   0xe   :  { %28 = vsyncpa [#allocation8 + $0x1], 0  ;;  %s2346_s21 = smov 0   ;;  %s2348_s22 = smov 0  }
   0xf   :  { %s2350_s23 = smov 0   ;;  %s2352_s24 = smov 0  }
  0x10   :  { %s2354_s25 = smov 0   ;;  %s2356_s26 = smov 0  }
  0x11 LB: > { %2764 = sst [smem:[#allocation28_spill]] %s2239_s21  ;;  %s2377_s27 = sadd.s32 4294967295, %s2259_s26   ;;  %s2259_s26 = sphi %s2356_s26, %s34_s26   ;;  %s2255_s25 = sphi %s2354_s25, %s2806_s25   ;;  %s2251_s24 = sphi %s2352_s24, %s2805_s24   ;;  %s2247_s23 = sphi %s2350_s23, %s2809_s23   ;;  %s2243_s22 = sphi %s2348_s22, %s2808_s22   ;;  %s2239_s21 = sphi %s2346_s21, %s2807_s21  }
  0x12   : > { %2765 = sst [smem:[#allocation29_spill]] %s2255_s25  ;;  %p1589_p0 = scmp.ge.s32.totalorder %s2259_s26, 1 }
  0x13   : > { %2766 = sst [smem:[#allocation30_spill]] %s2259_s26  ;;  %p2743_p1 = scmp.eq.s32.totalorder %s2377_s27, 0 }
  0x14   : > { %p353_p2 = scmp.lt.s32.totalorder %s2259_s26, 3  ;;  %s2261_s29 = smov [#allocation12]  }
  0x15   : > { %s365_s30 = sshll.u32 %s2261_s29, 4  ;;  %s2262_s14 = smov [#allocation15]   ;;  %s366_s30 = int_to_ptr.vmem [resolvable:$true] %s365_s30 }
  0x16   : > { %p2382_p3 = pnand %p1589_p0, %p353_p2  ;;  %s389_s15 = sshll.u32 %s2262_s14, 4  ;;  %s390_s15 = int_to_ptr.vmem [resolvable:$true] %s389_s15 }
  0x17   : > { %s2263_s16 = smov [#allocation18]   ;;  %s1934_s19 = scalar_lea.vmem %s366_s30, 256 }
  0x18   : > { %s2767_s28 = scalar_select %p2382_p3, 1, 0 }
  0x19   : > { %p1785_p4 = pneg %p2382_p3  ;;  %s413_s17 = sshll.u32 %s2263_s16, 4  ;;  %s414_s17 = int_to_ptr.vmem [resolvable:$true] %s413_s17 }
  0x1a   : > { %p1935_p8 = scmp.ne.s32.totalorder %s366_s30, %s1934_s19  ;;  %p1942_p11 = scmp.lt.s32.totalorder %s366_s30, %s366_s30 }
  0x1b   : > { %p2391_p6 = pnand %p1785_p4, %p2743_p1  ;;  %p1943_p12 = scmp.lt.s32.totalorder %s1934_s19, %s1934_s19 }
  0x1d   : > { %s2768_s13 = scalar_select %p2391_p6, 1, 0 }
  0x1e   : > { %p2397_p7 = pneg %p2391_p6  ;;  %p1944_p13 = por %p1943_p12, %p1942_p11 }
  0x20   : > { %p1937_p9 = pnand %p1935_p8, %p2397_p7 }
  0x22   : > { %p1938_p10 = pneg %p1937_p9 }
  0x24   : > { %p1945_p0 = pnand %p1944_p13, %p1938_p10 }
  0x26   : > { %1948 = shalt.err (!%p1945_p0)
}
  0x27   : > { %s2264_s20 = smov 64   ;;  %s2265_s29 = smov 4  }
  0x28   : > { %s2770_s4 = sld [smem:[#allocation35_spill]]  ;;  %s1960_s12 = scalar_lea.vmem %s390_s15, 256 }
  0x29   : > { %p1961_p2 = scmp.ne.s32.totalorder %s390_s15, %s1960_s12  ;;  %p1968_p9 = scmp.lt.s32.totalorder %s390_s15, %s390_s15 }
  0x2a   : > { %p1969_p5 = scmp.lt.s32.totalorder %s1960_s12, %s1960_s12 }
  0x2b   : > { %p1963_p4 = pnand %p1961_p2, %p2397_p7 }
  0x2c   : > { %p1970_p1 = por %p1969_p5, %p1968_p9 }
  0x2d   : > { %p1964_p8 = pneg %p1963_p4 }
  0x2e   : > { %1788 = dma.hbm_to_vmem [thread:$0]  (!%p2391_p6), %s2770_s4, 256, %s366_s30, [#allocation13], %s2264_s20, %s2264_s20, %s2265_s29  }
  0x2f   : > { %p1971_p11 = pnand %p1970_p1, %p1964_p8 }
  0x31   : > { %1974 = shalt.err (!%p1971_p11)
}
  0x32   : > { %s2771_s6 = sld [smem:[#allocation36_spill]]  ;;  %s1986_s14 = scalar_lea.vmem %s414_s17, 256 }
  0x33   : > { %p1987_p10 = scmp.ne.s32.totalorder %s414_s17, %s1986_s14  ;;  %p1994_p0 = scmp.lt.s32.totalorder %s414_s17, %s414_s17 }
  0x34   : > { %p1995_p2 = scmp.lt.s32.totalorder %s1986_s14, %s1986_s14 }
  0x35   : > { %p1989_p12 = pnand %p1987_p10, %p2397_p7 }
  0x36   : > { %p1996_p4 = por %p1995_p2, %p1994_p0 }
  0x37   : > { %p1990_p13 = pneg %p1989_p12 }
  0x38   : > { %1794 = dma.hbm_to_vmem [thread:$0]  (!%p2391_p6), %s2771_s6, 256, %s390_s15, [#allocation16], %s2264_s20, %s2264_s20, %s2265_s29  }
  0x39   : > { %p1997_p3 = pnand %p1996_p4, %p1990_p13 }
  0x3b   : > { %2000 = shalt.err (!%p1997_p3)
}
  0x3c   : > { %s2772_s8 = sld [smem:[#allocation37_spill]]  ;;  %s1588_s11 = sadd.s32 4294967294, %s2259_s26  }
  0x3d   : > { %s46_s15 = sadd.s32 1, %s2255_s25  ;;  %s55_s16 = sadd.s32 1, %s2247_s23 }
  0x3e   : > { %p48_p1 = scmp.ge.s32.totalorder %s46_s15, 2  ;;  %p62_p3 = scmp.ne.s32.totalorder %s2247_s23, %s2243_s22 }
  0x3f   : > { %p63_p5 = scmp.eq.s32.totalorder %s2259_s26, 0  ;;  %p68_p8 = scmp.ne.s32.totalorder %s2243_s22, %s2239_s21 }
  0x40   : > { %s2811_s15 = smov (%p48_p1, %s46_s15), 0  ;;  %p2775_p11 = scmp.eq.s32.totalorder %s2377_s27, 0 }
  0x41   : > { %2773 = sst [smem:[#allocation31_spill]] %s2811_s15  ;;  %p2432_p9 = por %p63_p5, %p62_p3 }
  0x42   : > { %1800 = dma.hbm_to_vmem [thread:$0]  (!%p2391_p6), %s2772_s8, 256, %s414_s17, [#allocation19], %s2264_s20, %s2264_s20, %s2265_s29  }
  0x43   : > { %p2438_p10 = por %p2775_p11, %p68_p8  ;;  %s50_s20 = ssub.s32 %s2255_s25, %s2811_s15 }
  0x44   : > { %p340_p12 = scmp.eq.s32.totalorder %s2377_s27, 1  ;;  %p53_p13 = scmp.eq.s32.totalorder %s50_s20, 0 }
  0x45   : > { %s2776_s17 = scalar_select %p2438_p10, 1, 0 }
  0x46   : > { %p346_p0 = scmp.eq.s32.totalorder %s1588_s11, 1  ;;  %p2445_p2 = por %p340_p12, %p62_p3 }
  0x47   : > { %p1824_p4 = scmp.lt.s32.totalorder %s2259_s26, 2  ;;  %s2747_s30 = sand.u32 1, %s2247_s23  }
  0x48   : > { %s2777_s29 = scalar_select %p2445_p2, 1, 0 }
  0x49   : > { %s2451_s14 = scalar_select %p53_p13, %s2247_s23, %s55_s16  }
  0x4a   : > { %2778 = sst [smem:[#allocation32_spill]] %s2777_s29  ;;  %p2453_p1 = por %p346_p0, %p68_p8 }
  0x4b   : > { %2779 = sst [smem:[#allocation33_spill]] %s2451_s14  ;;  %s2460_s4 = sshll.u32 %s2747_s30, 3 }
  0x4c   : > { %s2780_s12 = scalar_select %p2453_p1, 1, 0 }
  0x4d   : > { %s2463_s6 = sshll.u32 %s2255_s25, 7  ;;  %p2467_p3 = pnand %p1824_p4, %p2432_p9 }
  0x4e   : > { %2781 = sst [smem:[#allocation34_spill]] %s2780_s12  ;;  %s463_s16 = sand.u32 1, %s2259_s26  }
  0x4f   : > { %s472_s15 = scalar_lea.hbm %s2730_s1, %s2463_s6  ;;  %s467_s14 = scalar_lea.vmem [#allocation9], %s2460_s4 }
  0x50   : > { %s474_s12 = sshll.u32 %s467_s14, 4  ;;  %s2266_s30 = smov [#allocation14]   ;;  %s475_s12 = int_to_ptr.vmem [resolvable:$true] %s474_s12 }
  0x51   : > { %s379_s21 = sshll.u32 %s2266_s30, 4  ;;  %s2477_s25 = scalar_lea.sflag [#allocation10], %s463_s16  ;;  %s380_s21 = int_to_ptr.vmem [resolvable:$true] %s379_s21 }
  0x52   : > { %p2754_p5 = pneg %p2467_p3  ;;  %s2014_s19 = scalar_lea.vmem %s475_s12, 128 }
  0x53   : > { %p2015_p8 = scmp.ne.s32.totalorder %s475_s12, %s2014_s19  ;;  %s2267_s26 = smov [#allocation9]  }
  0x54   : > { %s2019_s29 = sshll.u32 %s2267_s26, 4  ;;  %s2020_s29 = int_to_ptr.vmem [resolvable:$false] %s2019_s29 }
  0x55   : > { %p2017_p9 = pnand %p2015_p8, %p2754_p5  ;;  %s2021_s8 = scalar_lea.vmem %s2020_s29, 256 }
  0x56   : > { %p2022_p12 = scmp.lt.s32.totalorder %s475_s12, %s2020_s29  ;;  %p2023_p13 = scmp.lt.s32.totalorder %s2021_s8, %s2014_s19 }
  0x57   : > { %p2018_p11 = pneg %p2017_p9 }
  0x58   : > { %p2024_p0 = por %p2023_p13, %p2022_p12 }
  0x5a   : > { %p2025_p4 = pnand %p2024_p0, %p2018_p11 }
  0x5c   : > { %2028 = shalt.err (!%p2025_p4)
}
  0x5d   : > { %1810 = dma.hbm_to_vmem [thread:$0]  (!%p2467_p3), %s472_s15, 128, %s475_s12, %s2477_s25  }
  0x5e   : > { %s2040_s14 = scalar_lea.vmem %s380_s21, 16  ;;  %s2047_s30 = scalar_lea.vmem %s380_s21, 32 }
  0x5f   : > { %p2041_p1 = scmp.ne.s32.totalorder %s380_s21, %s2040_s14  ;;  %p2048_p5 = scmp.lt.s32.totalorder %s380_s21, %s380_s21 }
  0x60   : > { %p2049_p2 = scmp.lt.s32.totalorder %s2047_s30, %s2040_s14 }
  0x61   : > { %p2043_p8 = pnand %p2041_p1, %p2397_p7 }
  0x62   : > { %p2050_p10 = por %p2049_p2, %p2048_p5 }
  0x63   : > { %p2044_p9 = pneg %p2043_p8 }
  0x65   : > { %p2051_p6 = pnand %p2050_p10, %p2044_p9 }
  0x67   : > { %2054 = shalt.err (!%p2051_p6)
}
  0x68   : > { %p2783_p11 = scmp.ne.s32.totalorder %s2768_s13, 0  ;;  %s2268_s15 = smov [#allocation17]  }
  0x69   : > { %s403_s12 = sshll.u32 %s2268_s15, 4  ;;  %s2269_s16 = smov [#allocation20]   ;;  %s404_s12 = int_to_ptr.vmem [resolvable:$true] %s403_s12 }
  0x6a   : > { %1791 = dma.hbm_to_vmem [thread:$0]  (!%p2783_p11), %s2734_s5, 16, %s380_s21, [#allocation13]  }
  0x6b   : > { %s427_s20 = sshll.u32 %s2269_s16, 4  ;;  %s2066_s19 = scalar_lea.vmem %s404_s12, 16  ;;  %s428_s20 = int_to_ptr.vmem [resolvable:$true] %s427_s20 }
  0x6c   : > { %p2067_p1 = scmp.ne.s32.totalorder %s404_s12, %s2066_s19  ;;  %s2073_s8 = scalar_lea.vmem %s404_s12, 32 }
  0x6d   : > { %p2074_p10 = scmp.lt.s32.totalorder %s404_s12, %s404_s12  ;;  %p2075_p6 = scmp.lt.s32.totalorder %s2073_s8, %s2066_s19 }
  0x6e   : > { %p2069_p12 = pnand %p2067_p1, %p2397_p7 }
  0x6f   : > { %p2076_p2 = por %p2075_p6, %p2074_p10 }
  0x70   : > { %p2070_p13 = pneg %p2069_p12 }
  0x72   : > { %p2077_p5 = pnand %p2076_p2, %p2070_p13 }
  0x74   : > { %2080 = shalt.err (!%p2077_p5)
}
  0x75   : > { %1797 = dma.hbm_to_vmem [thread:$0]  (!%p2783_p11), %s2736_s7, 16, %s404_s12, [#allocation16]  }
  0x76   : > { %s2092_s30 = scalar_lea.vmem %s428_s20, 16  ;;  %s2099_s26 = scalar_lea.vmem %s428_s20, 32 }
  0x77   : > { %p2093_p0 = scmp.ne.s32.totalorder %s428_s20, %s2092_s30  ;;  %p2100_p9 = scmp.lt.s32.totalorder %s428_s20, %s428_s20 }
  0x78   : > { %p2101_p1 = scmp.lt.s32.totalorder %s2099_s26, %s2092_s30 }
  0x79   : > { %p2095_p4 = pnand %p2093_p0, %p2397_p7 }
  0x7a   : > { %p2102_p12 = por %p2101_p1, %p2100_p9 }
  0x7b   : > { %p2096_p8 = pneg %p2095_p4 }
  0x7d   : > { %p2103_p10 = pnand %p2102_p12, %p2096_p8 }
  0x7f   : > { %2106 = shalt.err (!%p2103_p10)
}
  0x80   : > { %1803 = dma.hbm_to_vmem [thread:$0]  (!%p2783_p11), %s2738_s9, 16, %s428_s20, [#allocation19]  }
  0x81   : > { %s454_s16 = scalar_lea.hbm %s2729_s0, %s2463_s6  ;;  %s448_s19 = scalar_lea.vmem [#allocation6], %s2460_s4 }
  0x82   : > { %s456_s8 = sshll.u32 %s448_s19, 4  ;;  %s490_s13 = scalar_lea.hbm %s2731_s2, %s2463_s6  ;;  %s457_s8 = int_to_ptr.vmem [resolvable:$true] %s456_s8 }
  0x83   : > { %s2784_s30 = sand.u32 1, %s2247_s23   ;;  %s2120_s29 = scalar_lea.vmem %s457_s8, 128 }
  0x84   : > { %s445_s26 = scalar_lea.sflag [#allocation7], %s2784_s30  ;;  %p2121_p7 = scmp.ne.s32.totalorder %s457_s8, %s2120_s29 }
  0x85   : > { %p2785_p13 = pneg %p2467_p3  ;;  %s2270_s20 = smov [#allocation6]  }
  0x86   : > { %s2125_s15 = sshll.u32 %s2270_s20, 4  ;;  %s2126_s15 = int_to_ptr.vmem [resolvable:$false] %s2125_s15 }
  0x87   : > { %p2123_p6 = pnand %p2121_p7, %p2785_p13  ;;  %s2127_s18 = scalar_lea.vmem %s2126_s15, 256 }
  0x88   : > { %p2128_p11 = scmp.lt.s32.totalorder %s457_s8, %s2126_s15  ;;  %p2129_p5 = scmp.lt.s32.totalorder %s2127_s18, %s2120_s29 }
  0x89   : > { %p2124_p2 = pneg %p2123_p6 }
  0x8a   : > { %p2130_p0 = por %p2129_p5, %p2128_p11 }
  0x8c   : > { %p2131_p4 = pnand %p2130_p0, %p2124_p2 }
  0x8e   : > { %2134 = shalt.err (!%p2131_p4)
}
  0x8f   : > { %1807 = dma.hbm_to_vmem [thread:$0]  (!%p2467_p3), %s454_s16, 128, %s457_s8, %s445_s26  }
  0x90   : > { %s485_s12 = scalar_lea.vmem [#allocation11], %s2460_s4  ;;  %p2786_p9 = pmov %p2785_p13 }
  0x91   : > { %s492_s19 = sshll.u32 %s485_s12, 4  ;;  %s2271_s21 = smov [#allocation11]   ;;  %s493_s19 = int_to_ptr.vmem [resolvable:$true] %s492_s19 }
  0x92   : > { %s2148_s14 = scalar_lea.vmem %s493_s19, 128  ;;  %s2153_s30 = sshll.u32 %s2271_s21, 4  ;;  %s2154_s30 = int_to_ptr.vmem [resolvable:$false] %s2153_s30 }
  0x93   : > { %p2149_p8 = scmp.ne.s32.totalorder %s493_s19, %s2148_s14  ;;  %s2155_s29 = scalar_lea.vmem %s2154_s30, 256 }
  0x94   : > { %p2156_p10 = scmp.lt.s32.totalorder %s493_s19, %s2154_s30  ;;  %p2157_p7 = scmp.lt.s32.totalorder %s2155_s29, %s2148_s14 }
  0x95   : > { %p2151_p1 = pnand %p2149_p8, %p2786_p9 }
  0x96   : > { %p2158_p13 = por %p2157_p7, %p2156_p10 }
  0x97   : > { %p2152_p12 = pneg %p2151_p1 }
  0x99   : > { %p2159_p6 = pnand %p2158_p13, %p2152_p12 }
  0x9b   : > { %2162 = shalt.err (!%p2159_p6)
}
  0x9c   : > { %1813 = dma.hbm_to_vmem [thread:$0]  (!%p2467_p3), %s490_s13, 128, %s493_s19, %s2477_s25  }
  0x9d   : > { %p2787_p2 = scmp.ne.s32.totalorder %s2767_s28, 0 }
  0x9e   : > { %s2539_s8 = sand.u32 (!%p2787_p2), 1, %s2243_s22   ;;  %p2788_p11 = scmp.ne.s32.totalorder (!%p2787_p2), %s2776_s17, 0 }
  0x9f   : > { %507 = sbr.rel (%p2787_p2) target bundleno = 1572 (0x624), region = 68  ;;  %s2542_s26 = sshll.u32 (!%p2787_p2), %s2539_s8, 3 }
  0xa0   : > { %s510_s11 = scalar_lea.sflag (!%p2787_p2), [#allocation7], %s2539_s8  ;;  %s513_s20 = scalar_lea.vmem (!%p2787_p2), [#allocation6], %s2542_s26 }
  0xa4   : > { %2214 = dma.done.wait (%p2788_p11), %s510_s11, 128  }
  0xa5   : > { %2216 = vsyncadd (%p2788_p11), %s510_s11, 4294967168  ;;  %s518_s6 = sand.u32 1, %s2377_s27   ;;  %s522_s28 = scalar_lea.vmem [#allocation9], %s2542_s26 }
  0xa6   : > { %s519_s25 = scalar_lea.sflag [#allocation10], %s518_s6 }
  0xa7   : > { %2218 = dma.done.wait (%p2788_p11), %s519_s25, 256  }
  0xa8   : > { %2220 = vsyncadd (%p2788_p11), %s519_s25, 4294967040  ;;  %s531_s13 = scalar_lea.vmem [#allocation11], %s2542_s26  ;;  %p2789_p3 = scmp.eq.s32.totalorder %s2377_s27, 0 }
  0xaa   : > { %2222 = dma.done.wait (%p2789_p3), [#allocation13], 272   ;;  %p2790_p5 = pmov %p2789_p3 }
  0xab   : > { %p2791_p0 = pmov %p2789_p3 }
  0xac   : > { %2224 = vsyncadd (%p2790_p5), [#allocation13], 4294967024 }
  0xad   : > { %2226 = dma.done.wait (%p2791_p0), [#allocation16], 272   ;;  %p2792_p4 = pmov %p2791_p0 }
  0xae   : > { %p2793_p8 = pmov %p2791_p0 }
  0xaf   : > { %2228 = vsyncadd (%p2792_p4), [#allocation16], 4294967024 }
  0xb0   : > { %2230 = dma.done.wait (%p2793_p8), [#allocation19], 272   ;;  %p2794_p9 = pmov %p2791_p0 }
  0xb1   : > { %v2272_v0 = vmov 0.0   ;;  %vm2273_vm0 = vmmov 0   ;;  %v1896_v1 = vld [vmem:[#allocation15 + $0x8] sm:$0xff]   ;;  %v1897_v2 = vld [vmem:[#allocation15] sm:$0xff]   ;;  %vm642_vm1 = vcmask 261120   ;;  %v1898_v4 = vld [vmem:[#allocation12 + $0x8] sm:$0xff]   ;;  %v886_v50 = vlaneseq }
  0xb2   : > { %2232 = vsyncadd (%p2794_p9), [#allocation19], 4294967024  ;;  %1673 = vmatprep.subr.bf16.mxu0 %v2272_v0  ;;  %1677 = vmatprep.mubr.msk.bf16.mxu0 %vm2273_vm0, %v2272_v0  ;;  %v617_v3 = vld [vmem:[%s522_s28] sm:$0xff]  ;;  %v759_v7 = vld [vmem:[%s513_s20] sm:$0xff]  ;;  %vm687_vm2 = vcmask 257024   ;;  %vm837_vm3 = vcmask 64512  }
  0xb3   : > { %1681 = vmatprep.subr.bf16.mxu1 %v2272_v0  ;;  %1685 = vmatprep.mubr.msk.bf16.mxu1 %vm2273_vm0, %v2272_v0  ;;  %v618_v5 = vpack.c.bf16 %v617_v3, %v617_v3  ;;  %v1899_v6 = vld [vmem:[#allocation12] sm:$0xff]   ;;  %v760_v8 = vpack.c.bf16 %v759_v7, %v759_v7  ;;  %v1900_v9 = vld [vmem:[#allocation18 + $0x8] sm:$0xff]   ;;  %s2274_s27 = smov 112   ;;  %s2275_s17 = smov 120   ;;  %v1618_v32 = vld [vmem:[#allocation20] ss:$0 sm:$0xff] }
  0xb4   : > { %1674 = vmatpush3.bf16.msra.mxu0 %v1896_v1  ;;  %1682 = vmatpush3.bf16.msra.mxu1 %v1900_v9  ;;  %v1901_v10 = vld [vmem:[#allocation18] sm:$0xff]   ;;  %v689_v11 = vld [vmem:[%s531_s13] sm:$0xff]  ;;  %v1614_v13 = vld [vmem:[#allocation17] ss:$0 sm:$0xff]  ;;  %s2276_s15 = smov 104   ;;  %vm907_vm4 = vcmask 1043456  }
  0xb5   : > { %1675 = vmatprep.subr.bf16.mxu0 %v2272_v0  ;;  %1683 = vmatprep.subr.bf16.mxu1 %v2272_v0  ;;  %v690_v12 = vpack.c.bf16 %v689_v11, %v689_v11  ;;  %v1622_v20 = vld [vmem:[#allocation14] ss:$0 sm:$0xff]  ;;  %p609_p1 = scmp.lt.s32.totalorder %s2251_s24, 1  ;;  %v887_v52 = vshrl.u32 %v886_v50, 7  ;;  %s2277_s21 = smov 8   ;;  %vm1309_vm6 = vcmask 130048  }
  0xb6   : > { %s2278_s4 = smov 16   ;;  %s2279_s20 = smov 24   ;;  %vm1311_vm7 = vcmask 195584  }
  0xb7   : > { %s610_s18 = scalar_select %p609_p1, %s2251_s24, 1  ;;  %v888_v53 = vsub.s32 0, %v887_v52 }
  0xb8   : > { %1676 = vmatpush3.bf16.msra.mxu0 %v1897_v2  ;;  %1684 = vmatpush3.bf16.msra.mxu1 %v1901_v10  ;;  %s2795_s6 = sld [smem:[#allocation32_spill]] }
  0xb9   : > { %1689 = vmatprep.subr.bf16.mxu0 %v2272_v0  ;;  %1697 = vmatprep.subr.bf16.mxu1 %v2272_v0  ;;  %s611_s14 = scalar_lea.vmem %s2732_s3, %s610_s18  ;;  %s2796_s13 = sld [smem:[#allocation38_spill]] }
  0xba   : > { %v831_v51 = vld [vmem:[%s611_s14] sm:$0x1]  ;;  %s2797_s19 = sld [smem:[#allocation39_spill]] }
  0xbb   : > { %1678 = vmatmul.mubr.msk.bf16.vlgmr.msra.gmra.mxu0 %vm642_vm1, %v618_v5  ;;  %1686 = vmatmul.mubr.msk.bf16.vlgmr.msra.gmra.mxu1 %vm642_vm1, %v690_v12  ;;  %vm832_vm5 = vcmp.eq.f32.partialorder %v831_v51, 0.0 }
  0xbc   : > { %1690 = vmatpush3.bf16.msra.mxu0 %v1898_v4  ;;  %1693 = vmatprep.mubr.msk.bf16.mxu0 %vm2273_vm0, %v2272_v0  ;;  %v833_v54 = vsel %vm832_vm5, -1e+09, %v2272_v0 }
  0xbd   : > { %1691 = vmatprep.subr.bf16.mxu0 %v2272_v0  ;;  %1699 = vmatprep.mubr.msk.bf16.mxu1 %vm2273_vm0, %v2272_v0  ;;  %v889_v55 = vrot.slane %v833_v54, %v888_v53 }
  0xbe   : > { %p2798_p10 = scmp.ne.s32.totalorder %s2795_s6, 0 }
  0xc0   : > { %1692 = vmatpush3.bf16.msra.mxu0 %v1899_v6 }
  0xc1   : > { %1703 = vmatprep.subr.bf16.mxu0 %v2272_v0 }
  0xc3   : > { %1694 = vmatmul.mubr.msk.bf16.vlgmr.msra.gmra.mxu0 %vm642_vm1, %v760_v8 }
  0xc4   : > { %1705 = vmatprep.mubr.msk.bf16.mxu0 %vm2273_vm0, %v2272_v0 }
 0x17b   : > { %v680_v14 = vpop.f32.mrf.mxu0  ;;  %v751_v33 = vpop.f32.mrf.mxu1 }
 0x17c   : > { %v681_v15 = vadd.f32 %v1614_v13, %v680_v14  ;;  %v752_v34 = vadd.f32 %v1618_v32, %v751_v33 }
 0x17d   : > { %v1679_v16 = vpop.f32.mrf.mxu0  ;;  %v1687_v35 = vpop.f32.mrf.mxu1 }
 0x17e   : > { %v686_v17 = vpack.c.bf16 %v681_v15, %v681_v15  ;;  %v757_v36 = vpack.c.bf16 %v752_v34, %v752_v34 }
 0x17f   : > { %v683_v18 = vpop.f32.mrf.mxu0  ;;  %v754_v37 = vpop.f32.mrf.mxu1 }
 0x180   : > { %688 = vst.msk [vmem:[#allocation3] sm:$0xf] %vm687_vm2, %v686_v17  ;;  %758 = vst.msk [vmem:[#allocation4] sm:$0xf] %vm687_vm2, %v757_v36 }
 0x181   : > { %v1680_v19 = vpop.f32.mrf.mxu0  ;;  %v1688_v38 = vpop.f32.mrf.mxu1 }
 0x183   : > { %v822_v21 = vpop.f32.mrf.mxu0 }
 0x184   : > { %v823_v22 = vadd.f32 %v1622_v20, %v822_v21 }
 0x185   : > { %v1695_v23 = vpop.f32.mrf.mxu0 }
 0x186   : > { %v828_v24 = vpack.c.bf16 %v823_v22, %v823_v22 }
 0x187   : > { %v825_v25 = vpop.f32.mrf.mxu0  ;;  %v835_v26 = vld [vmem:[#allocation3] sm:$0xf]  ;;  %v2608_v39 = vld [vmem:[#allocation4] sm:$0xf] }
 0x188   : > { %830 = vst.msk [vmem:[#allocation2] sm:$0xf] %vm687_vm2, %v828_v24  ;;  %v842_v27 = vsel %vm837_vm3, %v835_v26, 0  ;;  %v1629_v28 = vcombine.low %v835_v26, %v835_v26  ;;  %v909_v40 = vsel %vm907_vm4, %v2608_v39, 0  ;;  %v1631_v26 = vcombine.low %v2608_v39, %v2608_v39 }
 0x189   : > { %v1696_v29 = vpop.f32.mrf.mxu0  ;;  %1698 = vmatpush3.bf16.xpose.msra.mxu1 %v842_v27  ;;  %1704 = vmatpush3.bf16.msra.mxu0 %v909_v40 }
 0x18a   : > { %1074 = vrot.lane.b32.xlu1 %v1629_v28, %s2274_s27  ;;  %959 = vrot.lane.b32.xlu0 %v1629_v28, %s2275_s17 }
 0x18b   : > { %1709 = vmatprep.subr.bf16.mxu1 %v2272_v0  ;;  %1715 = vmatprep.subr.bf16.mxu0 %v2272_v0 }
 0x18f   : > { %v834_v30 = vld [vmem:[#allocation2] sm:$0xf] }
 0x190   : > { %1700 = vmatmul.mubr.msk.bf16.vlgmr.msra.gmra.mxu1 %vm837_vm3, %v834_v30  ;;  %v1628_v31 = vcombine.low %v834_v30, %v834_v30 }
 0x191   : > { %1711 = vmatprep.mubr.msk.bf16.mxu1 %vm2273_vm0, %v2272_v0 }
 0x192   : > { %1072 = vrot.lane.b32.xlu1 %v1628_v31, %s2274_s27  ;;  %954 = vrot.lane.b32.xlu0 %v1628_v31, %s2275_s17 }
 0x196   : > { %1184 = vrot.lane.b32.xlu1 %v1628_v31, %s2276_s15  ;;  %1186 = vrot.lane.b32.xlu0 %v1629_v28, %s2276_s15 }
 0x1fc   : > { %v960_v41 = vpop.permute.xlu0 %959  ;;  %v1075_v43 = vpop.permute.xlu1 %1074 }
 0x1fd   : > { %v965_v42 = vsel %vm837_vm3, %v960_v41, 0  ;;  %v1080_v45 = vsel %vm837_vm3, %v1075_v43, 0 }
 0x1fe   : > { %1710 = vmatpush3.bf16.xpose.msra.mxu1 %v965_v42 }
 0x1ff   : > { %1721 = vmatprep.subr.bf16.mxu1 %v2272_v0 }
 0x204   : > { %v955_v44 = vpop.permute.xlu0 %954  ;;  %v1073_v47 = vpop.permute.xlu1 %1072 }
 0x205   : > { %1712 = vmatmul.mubr.msk.bf16.vlgmr.msra.gmra.mxu1 %vm837_vm3, %v955_v44 }
 0x206   : > { %1722 = vmatpush3.bf16.xpose.msra.mxu1 %v1080_v45  ;;  %1723 = vmatprep.mubr.msk.bf16.mxu1 %vm2273_vm0, %v2272_v0 }
 0x207   : > { %1733 = vmatprep.subr.bf16.mxu1 %v2272_v0 }
 0x208   : > { %v1187_v46 = vpop.permute.xlu0 %1186  ;;  %v1185_v49 = vpop.permute.xlu1 %1184 }
 0x209   : > { %v1192_v48 = vsel %vm837_vm3, %v1187_v46, 0 }
 0x20d   : > { %1724 = vmatmul.mubr.msk.bf16.vlgmr.msra.gmra.mxu1 %vm837_vm3, %v1073_v47 }
 0x20e   : > { %1734 = vmatpush3.bf16.xpose.msra.mxu1 %v1192_v48  ;;  %1735 = vmatprep.mubr.msk.bf16.mxu1 %vm2273_vm0, %v2272_v0 }
 0x20f   : > { %1745 = vmatprep.subr.bf16.mxu1 %v2272_v0 }
 0x215   : > { %1736 = vmatmul.mubr.msk.bf16.vlgmr.msra.gmra.mxu1 %vm837_vm3, %v1185_v49 }
 0x216   : > { %1749 = vmatprep.mubr.msk.bf16.mxu1 %vm2273_vm0, %v2272_v0 }
 0x250   : > { %v878_v56 = vpop.f32.mrf.mxu1 }
 0x251   : > { %v884_v57 = vmul.f32 0.35355338, %v878_v56 }
 0x252   : > { %v1701_v58 = vpop.f32.mrf.mxu1 }
 0x253   : > { %v891_v59 = vadd.f32 %v889_v55, %v884_v57 }
 0x254   : > { %v881_v60 = vpop.f32.mrf.mxu1 }
 0x255   : > { %v892_v61 = vsel %vm837_vm3, %v891_v59, -inf }
 0x256   : > { %893 = vmax.xlane.f32.xlu0 %v892_v61  ;;  %v1702_v62 = vpop.f32.mrf.mxu1 }
 0x2c5   : > { %v1001_v63 = vpop.f32.mrf.mxu1 }
 0x2c6   : > { %v1007_v1 = vmul.f32 0.35355338, %v1001_v63 }
 0x2c7   : > { %v1713_v2 = vpop.f32.mrf.mxu1 }
 0x2c8   : > { %v1008_v3 = vadd.f32 %v1007_v1, %v889_v55 }
 0x2c9   : > { %v1004_v4 = vpop.f32.mrf.mxu1 }
 0x2ca   : > { %v1009_v5 = vsel %vm837_vm3, %v1008_v3, -inf }
 0x2cb   : > { %1010 = vmax.xlane.f32.xlu1 %v1009_v5  ;;  %v1714_v6 = vpop.f32.mrf.mxu1 }
 0x2cd   : > { %v1116_v7 = vpop.f32.mrf.mxu1 }
 0x2ce   : > { %v1122_v8 = vmul.f32 0.35355338, %v1116_v7 }
 0x2cf   : > { %v1725_v9 = vpop.f32.mrf.mxu1 }
 0x2d0   : > { %v1123_v10 = vadd.f32 %v1122_v8, %v889_v55  ;;  %v1905_v9 = vld [vmem:[%s2739_s10 + $0x8] sm:$0xff]  }
 0x2d1   : > { %v1119_v11 = vpop.f32.mrf.mxu1  ;;  %1746 = vmatpush3.bf16.msra.mxu1 %v1905_v9 }
 0x2d2   : > { %v1124_v12 = vsel %vm837_vm3, %v1123_v10, -inf  ;;  %v1906_v11 = vld [vmem:[%s2739_s10] sm:$0xff]   ;;  %1747 = vmatprep.subr.bf16.mxu1 %v2272_v0 }
 0x2d3   : > { %1125 = vmax.xlane.f32.xlu0 %v1124_v12  ;;  %v1726_v13 = vpop.f32.mrf.mxu1 }
 0x2d5   : > { %v1228_v14 = vpop.f32.mrf.mxu1  ;;  %1748 = vmatpush3.bf16.msra.mxu1 %v1906_v11 }
 0x2d6   : > { %v1234_v15 = vmul.f32 0.35355338, %v1228_v14 }
 0x2d7   : > { %v1737_v16 = vpop.f32.mrf.mxu1 }
 0x2d8   : > { %v1235_v17 = vadd.f32 %v1234_v15, %v889_v55 }
 0x2d9   : > { %v1231_v18 = vpop.f32.mrf.mxu1 }
 0x2da   : > { %v1236_v19 = vsel %vm837_vm3, %v1235_v17, -inf }
 0x2db   : > { %1237 = vmax.xlane.f32.xlu0 %v1236_v19  ;;  %v1738_v20 = vpop.f32.mrf.mxu1 }
 0x2df   : > { %v894_v21 = vpop.xlane.xlu0 %893 }
 0x2e0   : > { %v895_v22 = vsub.f32 %v891_v59, %v894_v21 }
 0x2e2   : > { %v896_v23 = vmul.f32 1.442695, %v895_v22 }
 0x2e4   : > { %1907 = vpow2.f32 %v896_v23 }
 0x2f1   : > { %v1908_v24 = vpop.eup %1907 }
 0x2f2   : > { %v898_v25 = vsel %vm837_vm3, %v1908_v24, 0.0 }
 0x2f3   : > { %899 = vadd.xlane.f32.xlu1 %v898_v25 }
 0x304   : > { %1024 = vrot.lane.b32.xlu1 %v1631_v26, %s2275_s17  ;;  %s608_s17 = scalar_lea.vmem [#allocation21], %s2542_s26  ;;  %s2280_s26 = smov [#allocation21]  }
 0x305   : > { %s2167_s30 = sshll.u32 %s2280_s26, 4  ;;  %s2168_s30 = int_to_ptr.vmem [resolvable:$false] %s2167_s30 }
 0x306   : > { %s2169_s29 = scalar_lea.vmem %s2168_s30, 256 }
 0x354   : > { %v1011_v27 = vpop.xlane.xlu1 %1010 }
 0x355   : > { %v1012_v28 = vsub.f32 %v1008_v3, %v1011_v27 }
 0x357   : > { %v1013_v29 = vmul.f32 1.442695, %v1012_v28 }
 0x359   : > { %1909 = vpow2.f32 %v1013_v29 }
 0x35c   : > { %v1126_v30 = vpop.xlane.xlu0 %1125 }
 0x35d   : > { %v1127_v31 = vsub.f32 %v1123_v10, %v1126_v30 }
 0x35f   : > { %v1128_v32 = vmul.f32 1.442695, %v1127_v31 }
 0x361   : > { %1911 = vpow2.f32 %v1128_v32 }
 0x364   : > { %v1238_v33 = vpop.xlane.xlu0 %1237 }
 0x365   : > { %v1239_v34 = vsub.f32 %v1235_v17, %v1238_v33 }
 0x366   : > { %v1910_v35 = vpop.eup %1909 }
 0x367   : > { %v1240_v36 = vmul.f32 1.442695, %v1239_v34  ;;  %v1015_v37 = vsel %vm837_vm3, %v1910_v35, 0.0 }
 0x368   : > { %1016 = vadd.xlane.f32.xlu0 %v1015_v37 }
 0x369   : > { %1913 = vpow2.f32 %v1240_v36 }
 0x36e   : > { %v1912_v38 = vpop.eup %1911 }
 0x36f   : > { %v1130_v39 = vsel %vm837_vm3, %v1912_v38, 0.0 }
 0x370   : > { %1131 = vadd.xlane.f32.xlu1 %v1130_v39 }
 0x376   : > { %v1914_v40 = vpop.eup %1913 }
 0x377   : > { %v1242_v41 = vsel %vm837_vm3, %v1914_v40, 0.0 }
 0x378   : > { %1243 = vadd.xlane.f32.xlu0 %v1242_v41 }
 0x37c   : > { %v900_v42 = vpop.xlane.xlu1 %899 }
 0x37d   : > { %1915 = vrcp.f32 %v900_v42 }
 0x380   : > { %v1025_v45 = vpop.permute.xlu1 %1024 }
 0x381   : > { %1248 = vrot.lane.b32.xlu1 %v1631_v26, %s2276_s15  ;;  %v1030_v47 = vsel %vm907_vm4, %v1025_v45, 0  ;;  %s1398_s15 = sshll.u32 %s608_s17, 4  ;;  %s2682_s15 = int_to_ptr.vmem [resolvable:$true] %s1398_s15 }
 0x382   : > { %p2170_p6 = scmp.lt.s32.totalorder %s2682_s15, %s2168_s30 }
 0x38a   : > { %v1916_v43 = vpop.eup %1915 }
 0x38b   : > { %v902_v44 = vmul.f32 %v1916_v43, %v1908_v24 }
 0x38d   : > { %v903_v46 = vpack.c.bf16 %v902_v44, %v902_v44 }
 0x38e   : > { %1136 = vrot.lane.b32.xlu0 %v1631_v26, %s2274_s27  ;;  %v1637_v26 = vld [vmem:[%s2796_s13] ss:$0 sm:$0xff]  ;;  %s1642_s27 = sshll.u32 %s2251_s24, 7  ;;  %s2163_s24 = scalar_lea.vmem %s2682_s15, 128 }
 0x38f   : > { %1706 = vmatmul.mubr.msk.bf16.vlgmr.msra.gmra.mxu0 %vm837_vm3, %v903_v46  ;;  %s2680_s14 = scalar_lea.hbm %s2797_s19, %s1642_s27  ;;  %p2164_p12 = scmp.ne.s32.totalorder %s2682_s15, %s2163_s24 }
 0x390   : > { %1716 = vmatpush3.bf16.msra.mxu0 %v1030_v47  ;;  %1717 = vmatprep.mubr.msk.bf16.mxu0 %vm2273_vm0, %v2272_v0  ;;  %p2171_p2 = scmp.lt.s32.totalorder %s2169_s29, %s2163_s24 }
 0x391   : > { %1727 = vmatprep.subr.bf16.mxu0 %v2272_v0  ;;  %p2165_p7 = pnand %p2164_p12, %p2798_p10 }
 0x392   : > { %p2172_p11 = por %p2171_p2, %p2170_p6 }
 0x393   : > { %p2166_p13 = pneg %p2165_p7 }
 0x395   : > { %p2173_p3 = pnand %p2172_p11, %p2166_p13 }
 0x3f1   : > { %v1017_v48 = vpop.xlane.xlu0 %1016 }
 0x3f2   : > { %1917 = vrcp.f32 %v1017_v48 }
 0x3f9   : > { %v1132_v49 = vpop.xlane.xlu1 %1131 }
 0x3fa   : > { %1919 = vrcp.f32 %v1132_v49 }
 0x3fd   : > { %v1249_v58 = vpop.permute.xlu1 %1248 }
 0x3fe   : > { %v1254_v60 = vsel %vm907_vm4, %v1249_v58, 0 }
 0x3ff   : > { %v1918_v50 = vpop.eup %1917 }
 0x400   : > { %v1019_v51 = vmul.f32 %v1918_v50, %v1910_v35 }
 0x401   : > { %v1244_v52 = vpop.xlane.xlu0 %1243 }
 0x402   : > { %1921 = vrcp.f32 %v1244_v52  ;;  %v1020_v53 = vpack.c.bf16 %v1019_v51, %v1019_v51 }
 0x404   : > { %1718 = vmatmul.mubr.msk.bf16.vlgmr.msra.gmra.mxu0 %vm837_vm3, %v1020_v53 }
 0x405   : > { %v1137_v54 = vpop.permute.xlu0 %1136  ;;  %1729 = vmatprep.mubr.msk.bf16.mxu0 %vm2273_vm0, %v2272_v0 }
 0x406   : > { %v1142_v55 = vsel %vm907_vm4, %v1137_v54, 0 }
 0x407   : > { %v1920_v56 = vpop.eup %1919  ;;  %1728 = vmatpush3.bf16.msra.mxu0 %v1142_v55 }
 0x408   : > { %1739 = vmatprep.subr.bf16.mxu0 %v2272_v0  ;;  %v1134_v57 = vmul.f32 %v1920_v56, %v1912_v38 }
 0x40a   : > { %v1135_v59 = vpack.c.bf16 %v1134_v57, %v1134_v57 }
 0x40c   : > { %1730 = vmatmul.mubr.msk.bf16.vlgmr.msra.gmra.mxu0 %vm837_vm3, %v1135_v59 }
 0x40d   : > { %1740 = vmatpush3.bf16.msra.mxu0 %v1254_v60  ;;  %1741 = vmatprep.mubr.msk.bf16.mxu0 %vm2273_vm0, %v2272_v0 }
 0x40f   : > { %v1922_v61 = vpop.eup %1921 }
 0x410   : > { %v1246_v62 = vmul.f32 %v1922_v61, %v1914_v40 }
 0x412   : > { %v1247_v63 = vpack.c.bf16 %v1246_v62, %v1246_v62 }
 0x414   : > { %1742 = vmatmul.mubr.msk.bf16.vlgmr.msra.gmra.mxu0 %vm837_vm3, %v1247_v63 }
 0x44f   : > { %v945_v1 = vpop.f32.mrf.mxu0 }
 0x451   : > { %v1707_v2 = vpop.f32.mrf.mxu0 }
 0x453   : > { %v948_v3 = vpop.f32.mrf.mxu0 }
 0x455   : > { %v1708_v4 = vpop.f32.mrf.mxu0 }
 0x4c4   : > { %v1066_v5 = vpop.f32.mrf.mxu0 }
 0x4c5   : > { %1297 = vrot.lane.b32.xlu1 %v1066_v5, %s2277_s21  ;;  %s1384_s21 = scalar_lea.sflag [#allocation8], %s2539_s8 }
 0x4c6   : > { %v1719_v6 = vpop.f32.mrf.mxu0 }
 0x4c8   : > { %v1069_v7 = vpop.f32.mrf.mxu0 }
 0x4ca   : > { %v1720_v8 = vpop.f32.mrf.mxu0 }
 0x4cc   : > { %v1178_v10 = vpop.f32.mrf.mxu0 }
 0x4cd   : > { %1301 = vrot.lane.b32.xlu0 %v1178_v10, %s2278_s4 }
 0x4ce   : > { %v1731_v12 = vpop.f32.mrf.mxu0 }
 0x4d0   : > { %v1181_v13 = vpop.f32.mrf.mxu0 }
 0x4d2   : > { %v1732_v14 = vpop.f32.mrf.mxu0 }
 0x4d4   : > { %v1290_v15 = vpop.f32.mrf.mxu0 }
 0x4d5   : > { %1305 = vrot.lane.b32.xlu1 %v1290_v15, %s2279_s20 }
 0x4d6   : > { %v1743_v16 = vpop.f32.mrf.mxu0 }
 0x4d8   : > { %v1293_v17 = vpop.f32.mrf.mxu0 }
 0x4da   : > { %v1744_v18 = vpop.f32.mrf.mxu0 }
 0x537   : > { %v1298_v19 = vpop.permute.xlu1 %1297 }
 0x538   : > { %v1308_v21 = vsel %vm837_vm3, %v945_v1, %v1298_v19 }
 0x53f   : > { %v1302_v20 = vpop.permute.xlu0 %1301 }
 0x540   : > { %v1310_v22 = vsel %vm1309_vm6, %v1308_v21, %v1302_v20 }
 0x547   : > { %v1306_v23 = vpop.permute.xlu1 %1305 }
 0x548   : > { %v1312_v0 = vsel %vm1311_vm7, %v1310_v22, %v1306_v23 }
 0x549   : > { %v1313_v24 = vpack.c.bf16 %v1312_v0, %v1312_v0 }
 0x54b   : > { %1314 = vst.msk [vmem:[#allocation5] sm:$0xf] %vm687_vm2, %v1313_v24 }
 0x552   : > { %v1315_v25 = vld [vmem:[#allocation5] sm:$0xf] }
 0x553   : > { %1750 = vmatmul.mubr.msk.bf16.vlgmr.msra.gmra.mxu1 %vm642_vm1, %v1315_v25 }
 0x613   : > { %v1376_v27 = vpop.f32.mrf.mxu1 }
 0x614   : > { %v1377_v28 = vadd.f32 %v1637_v26, %v1376_v27 }
 0x615   : > { %v1751_v29 = vpop.f32.mrf.mxu1 }
 0x616   : > { %1382 = vst.msk [vmem:[%s608_s17] sm:$0xff] %vm642_vm1, %v1377_v28 }
 0x617   : > { %v1379_v30 = vpop.f32.mrf.mxu1 }
 0x618   : > { %2176 = shalt.err (!%p2173_p3)
}
 0x619   : > { %s2177_s4 = scalar_lea.hbm %s2680_s14, 128  ;;  %s2181_s11 = scalar_lea.hbm %s2797_s19, 256 }
 0x61a   : > { %p2178_p5 = scmp.ne.s32.totalorder %s2680_s14, %s2177_s4  ;;  %p2182_p8 = scmp.lt.s32.totalorder %s2680_s14, %s2797_s19 }
 0x61b   : > { %p2183_p9 = scmp.lt.s32.totalorder %s2181_s11, %s2177_s4 }
 0x61c   : > { %p2179_p0 = pnand %p2178_p5, %p2798_p10 }
 0x61d   : > { %p2184_p1 = por %p2183_p9, %p2182_p8 }
 0x61e   : > { %p2180_p4 = pneg %p2179_p0 }
 0x620   : > { %p2185_p12 = pnand %p2184_p1, %p2180_p4 }
 0x622   : > { %2188 = shalt.err (!%p2185_p12)
}
 0x623   : > { %1783 = dma.vmem_to_hbm [thread:$0]  (%p2798_p10), %s2682_s15, 128, %s2680_s14, %s1384_s21   ;;  %v1752_v31 = vpop.f32.mrf.mxu1 }
 0x624 PF: > { %s2799_s28 = sld [smem:[#allocation28_spill]] }
 0x625   : > { %s2800_s13 = sld [smem:[#allocation34_spill]] }
 0x626   : > { %s2801_s27 = sld [smem:[#allocation30_spill]] }
 0x62a   : > { %s1410_s17 = sand.u32 1, %s2799_s28  }
 0x62b   : > { %p2802_p7 = scmp.ne.s32.totalorder %s2800_s13, 0  ;;  %s1411_s18 = scalar_lea.sflag [#allocation8], %s1410_s17 }
 0x62c   : > { %p2803_p13 = scmp.ge.s32.totalorder %s2801_s27, 2 }
 0x62e   : > { %p1815_p6 = pnand %p2803_p13, %p2802_p7 }
 0x630   : > { %p1816_p2 = pneg %p1815_p6 }
 0x632   : > { %2234 = dma.done.wait (%p1816_p2), %s1411_s18, 128  }
 0x633   : > { %2236 = vsyncadd (%p1816_p2), %s1411_s18, 4294967168  ;;  %s34_s26 = sadd.s32 1, %s2801_s27   ;;  %s2804_s6 = sld [smem:[#allocation33_spill]] }
 0x634   : > { %p31_p11 = scmp.ge.s32.totalorder %s34_s26, 4   ;;  %s2805_s24 = sld [smem:[#allocation29_spill]] }
 0x635   : > { %s2806_s25 = sld [smem:[#allocation31_spill]]  ;;  %s2807_s21 = smov %s2243_s22 }
 0x636   : > { %s2808_s22 = smov %s2247_s23  ;;  %33 = sbr.rel (!%p31_p11) target bundleno = 17 (0x11), region = 168 }
 0x639   : > { %s2809_s23 = smov %s2804_s6 }
 0x63b   :  { %1416 = vsyncpa [#allocation7], 1 }
 0x63c   :  { %1418 = vsyncpa [#allocation7 + $0x1], 1 }
 0x63d   :  { %1419 = vsyncpa [#allocation10], 1 }
 0x63e   :  { %1421 = vsyncpa [#allocation10 + $0x1], 1 }
 0x63f   :  { %1422 = vsyncpa [#allocation13], 1 }
 0x640   :  { %1423 = vsyncpa [#allocation16], 1 }
 0x641   :  { %1424 = vsyncpa [#allocation19], 1 }
 0x642   :  { %1425 = vsyncpa [#allocation8], 1 }
 0x643   :  { %1427 = vsyncpa [#allocation8 + $0x1], 1 }

</bundles_post_ra>
